<compile_context>
chip_gen: v6e
topology: v6e:2x2x1
jax: 0.10.0
libtpu: 0.0.40
codegen_flags: <defaults>
</compile_context>

<pallas_src>
import math
import functools

import jax
import jax.numpy as jnp
from jax.experimental import pallas as pl
from jax.experimental.pallas import tpu as pltpu


def _block_kernel(x_ref,
                  ln1w_ref, ln1b_ref,
                  wq_ref, bq_ref, wk_ref, bk_ref, wv_ref, bv_ref,
                  wproj_ref, bproj_ref,
                  ln2w_ref, ln2b_ref,
                  wfc_ref, bfc_ref, wmp_ref, bmp_ref,
                  o_ref,
                  kT_scr, v_scr, y_scr,
                  *, n_head):
    f32 = jnp.float32
    bf16 = jnp.bfloat16
    T, C = x_ref.shape[1], x_ref.shape[2]
    tq = o_ref.shape[1]           # query tile == kv tile size
    nq = kT_scr.shape[0]          # number of kv tiles
    hd = C // n_head
    qi = pl.program_id(1)
    NEG = jnp.float32(-1e30)

    def layernorm(v, w, b):
        mu = jnp.mean(v, axis=-1, keepdims=True)
        var = jnp.mean((v - mu) ** 2, axis=-1, keepdims=True)
        return (v - mu) * jax.lax.rsqrt(var + 1e-5) * w + b

    # ---- once per batch element: K^T and V for the whole sequence ---------
    @pl.when(qi == 0)
    def _():
        xf = x_ref[0].astype(f32)                                   # (T, C)
        hf = layernorm(xf, ln1w_ref[0], ln1b_ref[0]).astype(bf16)
        k = jnp.dot(hf, wk_ref[...], preferred_element_type=f32) + bk_ref[0]
        v = jnp.dot(hf, wv_ref[...], preferred_element_type=f32) + bv_ref[0]
        for jj in range(nq):                                        # static
            r0 = jj * tq
            # one-time transpose per kv tile; frees XLU on the hot per-tile path
            kT_scr[jj] = jnp.transpose(k[r0:r0 + tq, :]).astype(bf16)  # (C, tq)
            v_scr[jj] = v[r0:r0 + tq, :].astype(bf16)                  # (tq, C)

    # ---- per query tile ----------------------------------------------------
    row0 = pl.multiple_of(qi * tq, tq)
    xt = x_ref[0, pl.ds(row0, tq), :].astype(f32)                   # (tq, C)
    ht = layernorm(xt, ln1w_ref[0], ln1b_ref[0])
    q = jnp.dot(ht.astype(bf16), wq_ref[...],
                preferred_element_type=f32) + bq_ref[0]             # (tq, C)

    scale = 1.0 / math.sqrt(hd)
    rows = qi * tq + jax.lax.broadcasted_iota(jnp.int32, (tq, tq), 0)
    cols = jax.lax.broadcasted_iota(jnp.int32, (tq, tq), 1)
    nkv = qi + 1                     # causal: only kv tiles 0..qi contribute

    def head_attn(h):
        lo = h * hd
        qh = (q[:, lo:lo + hd] * scale).astype(bf16)                # (tq, hd)

        def kv_step(j, carry):
            m, l, acc = carry
            kT = kT_scr[j, lo:lo + hd, :]                           # (hd, tq) bf16
            vj = v_scr[j, :, lo:lo + hd]                            # (tq, hd) bf16
            s = jnp.dot(qh, kT, preferred_element_type=f32)         # (tq, tq)
            s = jnp.where(j * tq + cols <= rows, s, NEG)
            m_new = jnp.maximum(m, jnp.max(s, axis=-1, keepdims=True))
            p = jnp.exp(s - m_new)
            alpha = jnp.exp(m - m_new)
            l_new = alpha * l + jnp.sum(p, axis=-1, keepdims=True)
            acc_new = alpha * acc + jnp.dot(p.astype(bf16), vj,
                                            preferred_element_type=f32)
            return m_new, l_new, acc_new

        m0 = jnp.full((tq, 1), NEG, f32)
        l0 = jnp.zeros((tq, 1), f32)
        a0 = jnp.zeros((tq, hd), f32)
        _, l, acc = jax.lax.fori_loop(0, nkv, kv_step, (m0, l0, a0))
        return acc * pl.reciprocal(l, approx=True)                  # (tq, hd) f32

    # group heads so y_scr writes are 128-wide (unmasked lane-dense stores)
    group = 1
    if hd < 128 and (128 % hd == 0) and (n_head % (128 // hd) == 0):
        group = 128 // hd
    for g0 in range(0, n_head, group):
        outs = [head_attn(h) for h in range(g0, g0 + group)]
        slab = outs[0] if group == 1 else jnp.concatenate(outs, axis=-1)
        y_scr[:, g0 * hd:(g0 + group) * hd] = slab.astype(bf16)

    attn_out = jnp.dot(y_scr[...], wproj_ref[...],
                       preferred_element_type=f32) + bproj_ref[0]
    x1 = xt + attn_out

    # ---- MLP branch --------------------------------------------------------
    h2 = layernorm(x1, ln2w_ref[0], ln2b_ref[0])
    f = jnp.dot(h2.astype(bf16), wfc_ref[...],
                preferred_element_type=f32) + bfc_ref[0]            # (tq, 4C)
    g = 0.5 * f * (1.0 + jnp.tanh(0.7978845608028654 * (f + 0.044715 * f * f * f)))
    m = jnp.dot(g.astype(bf16), wmp_ref[...],
                preferred_element_type=f32) + bmp_ref[0]

    o_ref[0] = (x1 + m).astype(o_ref.dtype)


def _pick_q_tile(T):
    for t in (256, 128, 64, 32, 16, 8):
        if T % t == 0:
            return t
    return T


def gpt2_block(x, params, *, n_head):
    B, T, C = x.shape
    (ln1w, ln1b, wqkv, bqkv, wproj, bproj,
     ln2w, ln2b, wfc, bfc, wmp, bmp) = params

    bf16 = jnp.bfloat16
    # Split fused qkv so K/V are projected once per batch element; matmul
    # weights stored in bf16 (MXU-native rate, half the resident bytes).
    wq = wqkv[:, :C].astype(bf16)
    wk = wqkv[:, C:2 * C].astype(bf16)
    wv = wqkv[:, 2 * C:].astype(bf16)
    bq, bk, bv = bqkv[:, :C], bqkv[:, C:2 * C], bqkv[:, 2 * C:]
    wproj_b = wproj.astype(bf16)
    wfc_b = wfc.astype(bf16)
    wmp_b = wmp.astype(bf16)

    tq = _pick_q_tile(T)
    nq = T // tq

    full = lambda a: pl.BlockSpec(a.shape, lambda b, qi: (0,) * a.ndim)

    itemsize = x.dtype.itemsize
    # causal attention -> half the (T,T,C) matmul work / exp count
    flops = int(B * (24 * T * C * C + 2 * T * T * C))
    transcendentals = int(B * (n_head * T * T // 2 + 4 * T * C))
    bytes_accessed = int(2 * B * T * C * itemsize          # x read + out write
                         + 2 * 12 * C * C                  # bf16 weights
                         + 4 * (4 + 2 * 3 + 1 + 4 + 1) * C)  # ln params + biases

    kernel = functools.partial(_block_kernel, n_head=n_head)
    return pl.pallas_call(
        kernel,
        out_shape=jax.ShapeDtypeStruct((B, T, C), x.dtype),
        grid_spec=pltpu.PrefetchScalarGridSpec(
            num_scalar_prefetch=0,
            grid=(B, nq),
            in_specs=[
                # full sequence for this batch element (block index constant in
                # qi, so it is fetched once per batch element); the query tile
                # is sliced out of it with pl.ds inside the kernel.
                pl.BlockSpec((1, T, C), lambda b, qi: (b, 0, 0)),
                full(ln1w), full(ln1b),
                full(wq), full(bq), full(wk), full(bk), full(wv), full(bv),
                full(wproj_b), full(bproj),
                full(ln2w), full(ln2b),
                full(wfc_b), full(bfc), full(wmp_b), full(bmp),
            ],
            out_specs=pl.BlockSpec((1, tq, C), lambda b, qi: (b, qi, 0)),
            scratch_shapes=[
                pltpu.VMEM((nq, C, tq), jnp.bfloat16),   # K^T cache (per batch)
                pltpu.VMEM((nq, tq, C), jnp.bfloat16),   # V cache   (per batch)
                pltpu.VMEM((tq, C), jnp.bfloat16),       # per-head attn outputs
            ],
        ),
        compiler_params=pltpu.CompilerParams(
            dimension_semantics=("parallel", "arbitrary"),
            # <= 75% of v7x's 64 MiB physical; plenty of headroom on v5e/v6e.
            vmem_limit_bytes=48 * 1024 * 1024,
        ),
        cost_estimate=pl.CostEstimate(
            flops=flops, transcendentals=transcendentals,
            bytes_accessed=bytes_accessed),
    )(x, ln1w, ln1b, wq, bq, wk, bk, wv, bv, wproj_b, bproj,
      ln2w, ln2b, wfc_b, bfc, wmp_b, bmp)


def init_params(key, n_embed):
    """Deterministic synthetic parameters (PyTorch Linear (out,in) weights are
    kept here pre-transposed as (in,out); biases kept as (1,out))."""
    ks = jax.random.split(key, 8)
    s = 0.02
    ln1w = jnp.ones((1, n_embed), jnp.float32)
    ln1b = jnp.zeros((1, n_embed), jnp.float32)
    wqkv = s * jax.random.normal(ks[0], (n_embed, 3 * n_embed), jnp.float32)
    bqkv = s * jax.random.normal(ks[1], (1, 3 * n_embed), jnp.float32)
    wproj = s * jax.random.normal(ks[2], (n_embed, n_embed), jnp.float32)
    bproj = s * jax.random.normal(ks[3], (1, n_embed), jnp.float32)
    ln2w = jnp.ones((1, n_embed), jnp.float32)
    ln2b = jnp.zeros((1, n_embed), jnp.float32)
    wfc = s * jax.random.normal(ks[4], (n_embed, 4 * n_embed), jnp.float32)
    bfc = s * jax.random.normal(ks[5], (1, 4 * n_embed), jnp.float32)
    wmp = s * jax.random.normal(ks[6], (4 * n_embed, n_embed), jnp.float32)
    bmp = s * jax.random.normal(ks[7], (1, n_embed), jnp.float32)
    return (ln1w, ln1b, wqkv, bqkv, wproj, bproj,
            ln2w, ln2b, wfc, bfc, wmp, bmp)


def reference_block(x, params, *, n_head):
    """Pure-JAX f32 reference matching the PyTorch forward, for validation."""
    (ln1w, ln1b, wqkv, bqkv, wproj, bproj,
     ln2w, ln2b, wfc, bfc, wmp, bmp) = params
    B, T, C = x.shape
    hd = C // n_head

    def ln(v, w, b):
        mu = jnp.mean(v, -1, keepdims=True)
        var = jnp.mean((v - mu) ** 2, -1, keepdims=True)
        return (v - mu) / jnp.sqrt(var + 1e-5) * w[0] + b[0]

    h = ln(x, ln1w, ln1b)
    qkv = h @ wqkv + bqkv[0]
    q, k, v = jnp.split(qkv, 3, axis=-1)
    q = q.reshape(B, T, n_head, hd).transpose(0, 2, 1, 3)
    k = k.reshape(B, T, n_head, hd).transpose(0, 2, 1, 3)
    v = v.reshape(B, T, n_head, hd).transpose(0, 2, 1, 3)
    s = jnp.einsum("bhqd,bhkd->bhqk", q, k) / math.sqrt(hd)
    mask = jnp.tril(jnp.ones((T, T), bool))
    s = jnp.where(mask, s, -jnp.inf)
    p = jax.nn.softmax(s, axis=-1)
    y = jnp.einsum("bhqk,bhkd->bhqd", p, v).transpose(0, 2, 1, 3).reshape(B, T, C)
    x1 = x + (y @ wproj + bproj[0])
    h2 = ln(x1, ln2w, ln2b)
    f = h2 @ wfc + bfc[0]
    g = 0.5 * f * (1.0 + jnp.tanh(0.7978845608028654 * (f + 0.044715 * f ** 3)))
    return x1 + (g @ wmp + bmp[0])


if __name__ == "__main__":
    key = jax.random.PRNGKey(0)
    # small smoke test + a case that exercises hd=64 head-pairing and nq=2
    # causal kv tiling (multiple query / kv tiles).
    for (B, T, C, n_head) in [(2, 8, 32, 4), (2, 512, 128, 2)]:
        kx, kp, key = jax.random.split(key, 3)
        x = jax.random.normal(kx, (B, T, C), jnp.float32)
        params = init_params(kp, C)

        out = jax.block_until_ready(gpt2_block(x, params, n_head=n_head))
        ref = reference_block(x, params, n_head=n_head)

        assert out.shape == (B, T, C)
        err = float(jnp.max(jnp.abs(out - ref)))
        # bf16 MXU inputs + approx reciprocal -> slightly relaxed tolerance
        assert err < 2e-2, f"mismatch (B={B},T={T},C={C}): max abs err = {err}"
    print("KERNEL_OK")
</pallas_src>

<mosaic_0001>
module attributes {stable_mosaic.version = 11 : i64} {
  func.func @_block_kernel(%arg0: i32, %arg1: i32, %arg2: memref<1x8x32xf32, #tpu.memory_space<vmem>>, %arg3: memref<1x32xf32, #tpu.memory_space<vmem>>, %arg4: memref<1x32xf32, #tpu.memory_space<vmem>>, %arg5: memref<32x32xbf16, #tpu.memory_space<vmem>>, %arg6: memref<1x32xf32, #tpu.memory_space<vmem>>, %arg7: memref<32x32xbf16, #tpu.memory_space<vmem>>, %arg8: memref<1x32xf32, #tpu.memory_space<vmem>>, %arg9: memref<32x32xbf16, #tpu.memory_space<vmem>>, %arg10: memref<1x32xf32, #tpu.memory_space<vmem>>, %arg11: memref<32x32xbf16, #tpu.memory_space<vmem>>, %arg12: memref<1x32xf32, #tpu.memory_space<vmem>>, %arg13: memref<1x32xf32, #tpu.memory_space<vmem>>, %arg14: memref<1x32xf32, #tpu.memory_space<vmem>>, %arg15: memref<32x128xbf16, #tpu.memory_space<vmem>>, %arg16: memref<1x128xf32, #tpu.memory_space<vmem>>, %arg17: memref<128x32xbf16, #tpu.memory_space<vmem>>, %arg18: memref<1x32xf32, #tpu.memory_space<vmem>>, %arg19: memref<1x8x32xf32, #tpu.memory_space<vmem>>, %arg20: memref<1x32x8xbf16, #tpu.memory_space<vmem>>, %arg21: memref<1x8x32xbf16, #tpu.memory_space<vmem>>, %arg22: memref<8x32xbf16, #tpu.memory_space<vmem>>) attributes {dimension_semantics = [#tpu.dimension_semantics<parallel>, #tpu.dimension_semantics<arbitrary>], iteration_bounds = array<i64: 2, 1>, scalar_prefetch = 0 : i64, scratch_operands = 3 : i64, tpu.core_type = #tpu.core_type<tc>, window_params = [{transform_indices = @transform_0, window_bounds = array<i64: 1, 8, 32>}, {pipeline_mode = #tpu.pipeline_mode<synchronous>, transform_indices = @transform_1, window_bounds = array<i64: 1, 32>}, {pipeline_mode = #tpu.pipeline_mode<synchronous>, transform_indices = @transform_2, window_bounds = array<i64: 1, 32>}, {pipeline_mode = #tpu.pipeline_mode<synchronous>, transform_indices = @transform_3, window_bounds = array<i64: 32, 32>}, {pipeline_mode = #tpu.pipeline_mode<synchronous>, transform_indices = @transform_4, window_bounds = array<i64: 1, 32>}, {pipeline_mode = #tpu.pipeline_mode<synchronous>, transform_indices = @transform_5, window_bounds = array<i64: 32, 32>}, {pipeline_mode = #tpu.pipeline_mode<synchronous>, transform_indices = @transform_6, window_bounds = array<i64: 1, 32>}, {pipeline_mode = #tpu.pipeline_mode<synchronous>, transform_indices = @transform_7, window_bounds = array<i64: 32, 32>}, {pipeline_mode = #tpu.pipeline_mode<synchronous>, transform_indices = @transform_8, window_bounds = array<i64: 1, 32>}, {pipeline_mode = #tpu.pipeline_mode<synchronous>, transform_indices = @transform_9, window_bounds = array<i64: 32, 32>}, {pipeline_mode = #tpu.pipeline_mode<synchronous>, transform_indices = @transform_10, window_bounds = array<i64: 1, 32>}, {pipeline_mode = #tpu.pipeline_mode<synchronous>, transform_indices = @transform_11, window_bounds = array<i64: 1, 32>}, {pipeline_mode = #tpu.pipeline_mode<synchronous>, transform_indices = @transform_12, window_bounds = array<i64: 1, 32>}, {pipeline_mode = #tpu.pipeline_mode<synchronous>, transform_indices = @transform_13, window_bounds = array<i64: 32, 128>}, {pipeline_mode = #tpu.pipeline_mode<synchronous>, transform_indices = @transform_14, window_bounds = array<i64: 1, 128>}, {pipeline_mode = #tpu.pipeline_mode<synchronous>, transform_indices = @transform_15, window_bounds = array<i64: 128, 32>}, {pipeline_mode = #tpu.pipeline_mode<synchronous>, transform_indices = @transform_16, window_bounds = array<i64: 1, 32>}, {transform_indices = @transform_17, window_bounds = array<i64: 1, 8, 32>}]} {
    %c0_i32 = arith.constant 0 : i32
    %0 = arith.cmpi eq, %arg1, %c0_i32 : i32
    %1 = arith.extui %0 : i1 to i32
    %c0_i32_0 = arith.constant 0 : i32
    %2 = arith.cmpi ne, %1, %c0_i32_0 : i32
    scf.if %2 {
      %c0_82 = arith.constant 0 : index
      %c0_83 = arith.constant 0 : index
      %c0_84 = arith.constant 0 : index
      %180 = vector.load %arg2[%c0_82, %c0_83, %c0_84] : memref<1x8x32xf32, #tpu.memory_space<vmem>>, vector<1x8x32xf32>
      %181 = vector.shape_cast %180 : vector<1x8x32xf32> to vector<8x32xf32>
      %c0_85 = arith.constant 0 : index
      %c0_86 = arith.constant 0 : index
      %182 = vector.load %arg3[%c0_85, %c0_86] : memref<1x32xf32, #tpu.memory_space<vmem>>, vector<1x32xf32>
      %183 = vector.shape_cast %182 : vector<1x32xf32> to vector<32xf32>
      %c0_87 = arith.constant 0 : index
      %c0_88 = arith.constant 0 : index
      %184 = vector.load %arg4[%c0_87, %c0_88] : memref<1x32xf32, #tpu.memory_space<vmem>>, vector<1x32xf32>
      %185 = vector.shape_cast %184 : vector<1x32xf32> to vector<32xf32>
      %cst_89 = arith.constant dense<0.000000e+00> : vector<8xf32>
      %186 = vector.multi_reduction <add>, %181, %cst_89 [1] : vector<8x32xf32> to vector<8xf32>
      %187 = vector.shape_cast %186 : vector<8xf32> to vector<8x1xf32>
      %cst_90 = arith.constant 3.200000e+01 : f32
      %188 = vector.broadcast %cst_90 : f32 to vector<8x1xf32>
      %189 = arith.divf %187, %188 : vector<8x1xf32>
      %190 = vector.broadcast %189 : vector<8x1xf32> to vector<8x32xf32>
      %191 = arith.subf %181, %190 : vector<8x32xf32>
      %192 = arith.mulf %191, %191 : vector<8x32xf32>
      %cst_91 = arith.constant dense<0.000000e+00> : vector<8xf32>
      %193 = vector.multi_reduction <add>, %192, %cst_91 [1] : vector<8x32xf32> to vector<8xf32>
      %194 = vector.shape_cast %193 : vector<8xf32> to vector<8x1xf32>
      %cst_92 = arith.constant 3.200000e+01 : f32
      %195 = vector.broadcast %cst_92 : f32 to vector<8x1xf32>
      %196 = arith.divf %194, %195 : vector<8x1xf32>
      %197 = vector.broadcast %189 : vector<8x1xf32> to vector<8x32xf32>
      %198 = arith.subf %181, %197 : vector<8x32xf32>
      %cst_93 = arith.constant 9.99999974E-6 : f32
      %199 = vector.broadcast %cst_93 : f32 to vector<8x1xf32>
      %200 = arith.addf %196, %199 : vector<8x1xf32>
      %201 = math.rsqrt %200 : vector<8x1xf32>
      %202 = vector.broadcast %201 : vector<8x1xf32> to vector<8x32xf32>
      %203 = arith.mulf %198, %202 : vector<8x32xf32>
      %204 = vector.shape_cast %183 : vector<32xf32> to vector<1x32xf32>
      %205 = vector.broadcast %204 : vector<1x32xf32> to vector<8x32xf32>
      %206 = arith.mulf %203, %205 : vector<8x32xf32>
      %207 = vector.shape_cast %185 : vector<32xf32> to vector<1x32xf32>
      %208 = vector.broadcast %207 : vector<1x32xf32> to vector<8x32xf32>
      %209 = arith.addf %206, %208 : vector<8x32xf32>
      %210 = arith.truncf %209 : vector<8x32xf32> to vector<8x32xbf16>
      %c0_94 = arith.constant 0 : index
      %c0_95 = arith.constant 0 : index
      %211 = vector.load %arg7[%c0_94, %c0_95] : memref<32x32xbf16, #tpu.memory_space<vmem>>, vector<32x32xbf16>
      %cst_96 = arith.constant dense<0.000000e+00> : vector<8x32xf32>
      %212 = tpu.matmul %210, %211, %cst_96 {dimension_numbers = #tpu.dot_dimension_numbers<[1], [0], [0], [1], [0, 0, 1, 1], [], []>} : vector<8x32xbf16>, vector<32x32xbf16>, vector<8x32xf32> -> vector<8x32xf32>
      %c0_97 = arith.constant 0 : index
      %c0_98 = arith.constant 0 : index
      %213 = vector.load %arg8[%c0_97, %c0_98] : memref<1x32xf32, #tpu.memory_space<vmem>>, vector<1x32xf32>
      %214 = vector.shape_cast %213 : vector<1x32xf32> to vector<32xf32>
      %215 = vector.shape_cast %214 : vector<32xf32> to vector<1x32xf32>
      %216 = vector.broadcast %215 : vector<1x32xf32> to vector<8x32xf32>
      %217 = arith.addf %212, %216 : vector<8x32xf32>
      %c0_99 = arith.constant 0 : index
      %c0_100 = arith.constant 0 : index
      %218 = vector.load %arg9[%c0_99, %c0_100] : memref<32x32xbf16, #tpu.memory_space<vmem>>, vector<32x32xbf16>
      %cst_101 = arith.constant dense<0.000000e+00> : vector<8x32xf32>
      %219 = tpu.matmul %210, %218, %cst_101 {dimension_numbers = #tpu.dot_dimension_numbers<[1], [0], [0], [1], [0, 0, 1, 1], [], []>} : vector<8x32xbf16>, vector<32x32xbf16>, vector<8x32xf32> -> vector<8x32xf32>
      %c0_102 = arith.constant 0 : index
      %c0_103 = arith.constant 0 : index
      %220 = vector.load %arg10[%c0_102, %c0_103] : memref<1x32xf32, #tpu.memory_space<vmem>>, vector<1x32xf32>
      %221 = vector.shape_cast %220 : vector<1x32xf32> to vector<32xf32>
      %222 = vector.shape_cast %221 : vector<32xf32> to vector<1x32xf32>
      %223 = vector.broadcast %222 : vector<1x32xf32> to vector<8x32xf32>
      %224 = arith.addf %219, %223 : vector<8x32xf32>
      %225 = tpu.transpose %217, [1, 0] : vector<8x32xf32> -> vector<32x8xf32>
      %226 = arith.truncf %225 : vector<32x8xf32> to vector<32x8xbf16>
      %c0_104 = arith.constant 0 : index
      %c0_105 = arith.constant 0 : index
      %c0_106 = arith.constant 0 : index
      %227 = vector.load %arg20[%c0_104, %c0_105, %c0_106] : memref<1x32x8xbf16, #tpu.memory_space<vmem>>, vector<1x32x8xbf16>
      %228 = vector.shape_cast %227 : vector<1x32x8xbf16> to vector<32x8xbf16>
      %229 = vector.shape_cast %226 : vector<32x8xbf16> to vector<1x32x8xbf16>
      tpu.vector_store %arg20[%c0_104, %c0_105, %c0_106], %229 {strides = array<i32>} : memref<1x32x8xbf16, #tpu.memory_space<vmem>>, vector<1x32x8xbf16>,
      %230 = arith.truncf %224 : vector<8x32xf32> to vector<8x32xbf16>
      %c0_107 = arith.constant 0 : index
      %c0_108 = arith.constant 0 : index
      %c0_109 = arith.constant 0 : index
      %231 = vector.load %arg21[%c0_107, %c0_108, %c0_109] : memref<1x8x32xbf16, #tpu.memory_space<vmem>>, vector<1x8x32xbf16>
      %232 = vector.shape_cast %231 : vector<1x8x32xbf16> to vector<8x32xbf16>
      %233 = vector.shape_cast %230 : vector<8x32xbf16> to vector<1x8x32xbf16>
      tpu.vector_store %arg21[%c0_107, %c0_108, %c0_109], %233 {strides = array<i32>} : memref<1x8x32xbf16, #tpu.memory_space<vmem>>, vector<1x8x32xbf16>,
    } else {
    }
    %c8_i32 = arith.constant 8 : i32
    %3 = arith.muli %arg1, %c8_i32 : i32
    %4 = tpu.assume_multiple %3, 8 : i32
    %c0 = arith.constant 0 : index
    %5 = arith.index_cast %4 : i32 to index
    %c0_1 = arith.constant 0 : index
    %6 = vector.load %arg2[%c0, %5, %c0_1] : memref<1x8x32xf32, #tpu.memory_space<vmem>>, vector<1x8x32xf32>
    %7 = vector.shape_cast %6 : vector<1x8x32xf32> to vector<8x32xf32>
    %c0_2 = arith.constant 0 : index
    %c0_3 = arith.constant 0 : index
    %8 = vector.load %arg3[%c0_2, %c0_3] : memref<1x32xf32, #tpu.memory_space<vmem>>, vector<1x32xf32>
    %9 = vector.shape_cast %8 : vector<1x32xf32> to vector<32xf32>
    %c0_4 = arith.constant 0 : index
    %c0_5 = arith.constant 0 : index
    %10 = vector.load %arg4[%c0_4, %c0_5] : memref<1x32xf32, #tpu.memory_space<vmem>>, vector<1x32xf32>
    %11 = vector.shape_cast %10 : vector<1x32xf32> to vector<32xf32>
    %cst = arith.constant dense<0.000000e+00> : vector<8xf32>
    %12 = vector.multi_reduction <add>, %7, %cst [1] : vector<8x32xf32> to vector<8xf32>
    %13 = vector.shape_cast %12 : vector<8xf32> to vector<8x1xf32>
    %cst_6 = arith.constant 3.200000e+01 : f32
    %14 = vector.broadcast %cst_6 : f32 to vector<8x1xf32>
    %15 = arith.divf %13, %14 : vector<8x1xf32>
    %16 = vector.broadcast %15 : vector<8x1xf32> to vector<8x32xf32>
    %17 = arith.subf %7, %16 : vector<8x32xf32>
    %18 = arith.mulf %17, %17 : vector<8x32xf32>
    %cst_7 = arith.constant dense<0.000000e+00> : vector<8xf32>
    %19 = vector.multi_reduction <add>, %18, %cst_7 [1] : vector<8x32xf32> to vector<8xf32>
    %20 = vector.shape_cast %19 : vector<8xf32> to vector<8x1xf32>
    %cst_8 = arith.constant 3.200000e+01 : f32
    %21 = vector.broadcast %cst_8 : f32 to vector<8x1xf32>
    %22 = arith.divf %20, %21 : vector<8x1xf32>
    %23 = vector.broadcast %15 : vector<8x1xf32> to vector<8x32xf32>
    %24 = arith.subf %7, %23 : vector<8x32xf32>
    %cst_9 = arith.constant 9.99999974E-6 : f32
    %25 = vector.broadcast %cst_9 : f32 to vector<8x1xf32>
    %26 = arith.addf %22, %25 : vector<8x1xf32>
    %27 = math.rsqrt %26 : vector<8x1xf32>
    %28 = vector.broadcast %27 : vector<8x1xf32> to vector<8x32xf32>
    %29 = arith.mulf %24, %28 : vector<8x32xf32>
    %30 = vector.shape_cast %9 : vector<32xf32> to vector<1x32xf32>
    %31 = vector.broadcast %30 : vector<1x32xf32> to vector<8x32xf32>
    %32 = arith.mulf %29, %31 : vector<8x32xf32>
    %33 = vector.shape_cast %11 : vector<32xf32> to vector<1x32xf32>
    %34 = vector.broadcast %33 : vector<1x32xf32> to vector<8x32xf32>
    %35 = arith.addf %32, %34 : vector<8x32xf32>
    %36 = arith.truncf %35 : vector<8x32xf32> to vector<8x32xbf16>
    %c0_10 = arith.constant 0 : index
    %c0_11 = arith.constant 0 : index
    %37 = vector.load %arg5[%c0_10, %c0_11] : memref<32x32xbf16, #tpu.memory_space<vmem>>, vector<32x32xbf16>
    %cst_12 = arith.constant dense<0.000000e+00> : vector<8x32xf32>
    %38 = tpu.matmul %36, %37, %cst_12 {dimension_numbers = #tpu.dot_dimension_numbers<[1], [0], [0], [1], [0, 0, 1, 1], [], []>} : vector<8x32xbf16>, vector<32x32xbf16>, vector<8x32xf32> -> vector<8x32xf32>
    %c0_13 = arith.constant 0 : index
    %c0_14 = arith.constant 0 : index
    %39 = vector.load %arg6[%c0_13, %c0_14] : memref<1x32xf32, #tpu.memory_space<vmem>>, vector<1x32xf32>
    %40 = vector.shape_cast %39 : vector<1x32xf32> to vector<32xf32>
    %41 = vector.shape_cast %40 : vector<32xf32> to vector<1x32xf32>
    %42 = vector.broadcast %41 : vector<1x32xf32> to vector<8x32xf32>
    %43 = arith.addf %38, %42 : vector<8x32xf32>
    %c8_i32_15 = arith.constant 8 : i32
    %44 = arith.muli %arg1, %c8_i32_15 : i32
    %45 = tpu.iota {dimensions = array<i32: 0>} : vector<8x8xi32>
    %46 = vector.broadcast %44 : i32 to vector<8x8xi32>
    %47 = arith.addi %46, %45 : vector<8x8xi32>
    %48 = tpu.iota {dimensions = array<i32: 1>} : vector<8x8xi32>
    %c1_i32 = arith.constant 1 : i32
    %49 = arith.addi %arg1, %c1_i32 : i32
    %50 = vector.extract_strided_slice %43 {offsets = [0, 0], sizes = [8, 8], strides = [1, 1]} : vector<8x32xf32> to vector<8x8xf32>
    %cst_16 = arith.constant 0.353553385 : f32
    %51 = vector.broadcast %cst_16 : f32 to vector<8x8xf32>
    %52 = arith.mulf %50, %51 : vector<8x8xf32>
    %53 = arith.truncf %52 : vector<8x8xf32> to vector<8x8xbf16>
    %cst_17 = arith.constant -1.000000e+30 : f32
    %54 = vector.broadcast %cst_17 : f32 to vector<8x1xf32>
    %cst_18 = arith.constant 0.000000e+00 : f32
    %55 = vector.broadcast %cst_18 : f32 to vector<8x1xf32>
    %cst_19 = arith.constant 0.000000e+00 : f32
    %56 = vector.broadcast %cst_19 : f32 to vector<8x8xf32>
    %cst_20 = arith.constant -1.000000e+30 : f32
    %c0_i32_21 = arith.constant 0 : i32
    %57 = arith.subi %49, %c0_i32_21 : i32
    %58 = arith.addi %c0_i32_21, %57 : i32
    %c1_i32_22 = arith.constant 1 : i32
    %59:3 = scf.for %arg23 = %c0_i32_21 to %58 step %c1_i32_22 iter_args(%arg24 = %54, %arg25 = %55, %arg26 = %56) -> (vector<8x1xf32>, vector<8x1xf32>, vector<8x8xf32>)  : i32 {
      %180 = arith.index_cast %arg23 : i32 to index
      %c0_82 = arith.constant 0 : index
      %c0_83 = arith.constant 0 : index
      %181 = vector.load %arg20[%180, %c0_82, %c0_83] : memref<1x32x8xbf16, #tpu.memory_space<vmem>>, vector<1x8x8xbf16>
      %182 = vector.shape_cast %181 : vector<1x8x8xbf16> to vector<8x8xbf16>
      %183 = arith.index_cast %arg23 : i32 to index
      %c0_84 = arith.constant 0 : index
      %c0_85 = arith.constant 0 : index
      %184 = vector.load %arg21[%183, %c0_84, %c0_85] : memref<1x8x32xbf16, #tpu.memory_space<vmem>>, vector<1x8x8xbf16>
      %185 = vector.shape_cast %184 : vector<1x8x8xbf16> to vector<8x8xbf16>
      %cst_86 = arith.constant dense<0.000000e+00> : vector<8x8xf32>
      %186 = tpu.matmul %53, %182, %cst_86 {dimension_numbers = #tpu.dot_dimension_numbers<[1], [0], [0], [1], [0, 0, 1, 1], [], []>} : vector<8x8xbf16>, vector<8x8xbf16>, vector<8x8xf32> -> vector<8x8xf32>
      %c8_i32_87 = arith.constant 8 : i32
      %187 = arith.muli %arg23, %c8_i32_87 : i32
      %188 = vector.broadcast %187 : i32 to vector<8x8xi32>
      %189 = arith.addi %188, %48 : vector<8x8xi32>
      %190 = arith.cmpi sle, %189, %47 : vector<8x8xi32>
      %191 = vector.broadcast %cst_20 : f32 to vector<8x8xf32>
      %192 = arith.select %190, %186, %191 : vector<8x8xi1>, vector<8x8xf32>
      %cst_88 = arith.constant dense<0xFF800000> : vector<8xf32>
      %193 = vector.multi_reduction <maximumf>, %192, %cst_88 [1] : vector<8x8xf32> to vector<8xf32>
      %194 = vector.shape_cast %193 : vector<8xf32> to vector<8x1xf32>
      %195 = arith.maximumf %arg24, %194 : vector<8x1xf32>
      %196 = vector.broadcast %195 : vector<8x1xf32> to vector<8x8xf32>
      %197 = arith.subf %192, %196 : vector<8x8xf32>
      %198 = math.exp %197 : vector<8x8xf32>
      %199 = arith.subf %arg24, %195 : vector<8x1xf32>
      %200 = math.exp %199 : vector<8x1xf32>
      %201 = arith.mulf %200, %arg25 : vector<8x1xf32>
      %cst_89 = arith.constant dense<0.000000e+00> : vector<8xf32>
      %202 = vector.multi_reduction <add>, %198, %cst_89 [1] : vector<8x8xf32> to vector<8xf32>
      %203 = vector.shape_cast %202 : vector<8xf32> to vector<8x1xf32>
      %204 = arith.addf %201, %203 : vector<8x1xf32>
      %205 = vector.broadcast %200 : vector<8x1xf32> to vector<8x8xf32>
      %206 = arith.mulf %205, %arg26 : vector<8x8xf32>
      %207 = arith.truncf %198 : vector<8x8xf32> to vector<8x8xbf16>
      %cst_90 = arith.constant dense<0.000000e+00> : vector<8x8xf32>
      %208 = tpu.matmul %207, %185, %cst_90 {dimension_numbers = #tpu.dot_dimension_numbers<[1], [0], [0], [1], [0, 0, 1, 1], [], []>} : vector<8x8xbf16>, vector<8x8xbf16>, vector<8x8xf32> -> vector<8x8xf32>
      %209 = arith.addf %206, %208 : vector<8x8xf32>
      scf.yield %195, %204, %209 : vector<8x1xf32>, vector<8x1xf32>, vector<8x8xf32>
    }
    %60 = tpu.reciprocal %59#1 {approx = true} : vector<8x1xf32> -> vector<8x1xf32>
    %61 = vector.broadcast %60 : vector<8x1xf32> to vector<8x8xf32>
    %62 = arith.mulf %59#2, %61 : vector<8x8xf32>
    %63 = arith.truncf %62 : vector<8x8xf32> to vector<8x8xbf16>
    %c0_23 = arith.constant 0 : index
    %c0_24 = arith.constant 0 : index
    %64 = vector.load %arg22[%c0_23, %c0_24] : memref<8x32xbf16, #tpu.memory_space<vmem>>, vector<8x8xbf16>
    tpu.vector_store %arg22[%c0_23, %c0_24], %63 {strides = array<i32>} : memref<8x32xbf16, #tpu.memory_space<vmem>>, vector<8x8xbf16>,
    %65 = vector.extract_strided_slice %43 {offsets = [0, 8], sizes = [8, 8], strides = [1, 1]} : vector<8x32xf32> to vector<8x8xf32>
    %cst_25 = arith.constant 0.353553385 : f32
    %66 = vector.broadcast %cst_25 : f32 to vector<8x8xf32>
    %67 = arith.mulf %65, %66 : vector<8x8xf32>
    %68 = arith.truncf %67 : vector<8x8xf32> to vector<8x8xbf16>
    %cst_26 = arith.constant -1.000000e+30 : f32
    %69 = vector.broadcast %cst_26 : f32 to vector<8x1xf32>
    %cst_27 = arith.constant 0.000000e+00 : f32
    %70 = vector.broadcast %cst_27 : f32 to vector<8x1xf32>
    %cst_28 = arith.constant 0.000000e+00 : f32
    %71 = vector.broadcast %cst_28 : f32 to vector<8x8xf32>
    %cst_29 = arith.constant -1.000000e+30 : f32
    %c0_i32_30 = arith.constant 0 : i32
    %72 = arith.subi %49, %c0_i32_30 : i32
    %73 = arith.addi %c0_i32_30, %72 : i32
    %c1_i32_31 = arith.constant 1 : i32
    %74:3 = scf.for %arg23 = %c0_i32_30 to %73 step %c1_i32_31 iter_args(%arg24 = %69, %arg25 = %70, %arg26 = %71) -> (vector<8x1xf32>, vector<8x1xf32>, vector<8x8xf32>)  : i32 {
      %180 = arith.index_cast %arg23 : i32 to index
      %c8_82 = arith.constant 8 : index
      %c0_83 = arith.constant 0 : index
      %181 = vector.load %arg20[%180, %c8_82, %c0_83] : memref<1x32x8xbf16, #tpu.memory_space<vmem>>, vector<1x8x8xbf16>
      %182 = vector.shape_cast %181 : vector<1x8x8xbf16> to vector<8x8xbf16>
      %183 = arith.index_cast %arg23 : i32 to index
      %c0_84 = arith.constant 0 : index
      %c8_85 = arith.constant 8 : index
      %184 = vector.load %arg21[%183, %c0_84, %c8_85] : memref<1x8x32xbf16, #tpu.memory_space<vmem>>, vector<1x8x8xbf16>
      %185 = vector.shape_cast %184 : vector<1x8x8xbf16> to vector<8x8xbf16>
      %cst_86 = arith.constant dense<0.000000e+00> : vector<8x8xf32>
      %186 = tpu.matmul %68, %182, %cst_86 {dimension_numbers = #tpu.dot_dimension_numbers<[1], [0], [0], [1], [0, 0, 1, 1], [], []>} : vector<8x8xbf16>, vector<8x8xbf16>, vector<8x8xf32> -> vector<8x8xf32>
      %c8_i32_87 = arith.constant 8 : i32
      %187 = arith.muli %arg23, %c8_i32_87 : i32
      %188 = vector.broadcast %187 : i32 to vector<8x8xi32>
      %189 = arith.addi %188, %48 : vector<8x8xi32>
      %190 = arith.cmpi sle, %189, %47 : vector<8x8xi32>
      %191 = vector.broadcast %cst_29 : f32 to vector<8x8xf32>
      %192 = arith.select %190, %186, %191 : vector<8x8xi1>, vector<8x8xf32>
      %cst_88 = arith.constant dense<0xFF800000> : vector<8xf32>
      %193 = vector.multi_reduction <maximumf>, %192, %cst_88 [1] : vector<8x8xf32> to vector<8xf32>
      %194 = vector.shape_cast %193 : vector<8xf32> to vector<8x1xf32>
      %195 = arith.maximumf %arg24, %194 : vector<8x1xf32>
      %196 = vector.broadcast %195 : vector<8x1xf32> to vector<8x8xf32>
      %197 = arith.subf %192, %196 : vector<8x8xf32>
      %198 = math.exp %197 : vector<8x8xf32>
      %199 = arith.subf %arg24, %195 : vector<8x1xf32>
      %200 = math.exp %199 : vector<8x1xf32>
      %201 = arith.mulf %200, %arg25 : vector<8x1xf32>
      %cst_89 = arith.constant dense<0.000000e+00> : vector<8xf32>
      %202 = vector.multi_reduction <add>, %198, %cst_89 [1] : vector<8x8xf32> to vector<8xf32>
      %203 = vector.shape_cast %202 : vector<8xf32> to vector<8x1xf32>
      %204 = arith.addf %201, %203 : vector<8x1xf32>
      %205 = vector.broadcast %200 : vector<8x1xf32> to vector<8x8xf32>
      %206 = arith.mulf %205, %arg26 : vector<8x8xf32>
      %207 = arith.truncf %198 : vector<8x8xf32> to vector<8x8xbf16>
      %cst_90 = arith.constant dense<0.000000e+00> : vector<8x8xf32>
      %208 = tpu.matmul %207, %185, %cst_90 {dimension_numbers = #tpu.dot_dimension_numbers<[1], [0], [0], [1], [0, 0, 1, 1], [], []>} : vector<8x8xbf16>, vector<8x8xbf16>, vector<8x8xf32> -> vector<8x8xf32>
      %209 = arith.addf %206, %208 : vector<8x8xf32>
      scf.yield %195, %204, %209 : vector<8x1xf32>, vector<8x1xf32>, vector<8x8xf32>
    }
    %75 = tpu.reciprocal %74#1 {approx = true} : vector<8x1xf32> -> vector<8x1xf32>
    %76 = vector.broadcast %75 : vector<8x1xf32> to vector<8x8xf32>
    %77 = arith.mulf %74#2, %76 : vector<8x8xf32>
    %78 = arith.truncf %77 : vector<8x8xf32> to vector<8x8xbf16>
    %c0_32 = arith.constant 0 : index
    %c8 = arith.constant 8 : index
    %79 = vector.load %arg22[%c0_32, %c8] : memref<8x32xbf16, #tpu.memory_space<vmem>>, vector<8x8xbf16>
    tpu.vector_store %arg22[%c0_32, %c8], %78 {strides = array<i32>} : memref<8x32xbf16, #tpu.memory_space<vmem>>, vector<8x8xbf16>,
    %80 = vector.extract_strided_slice %43 {offsets = [0, 16], sizes = [8, 8], strides = [1, 1]} : vector<8x32xf32> to vector<8x8xf32>
    %cst_33 = arith.constant 0.353553385 : f32
    %81 = vector.broadcast %cst_33 : f32 to vector<8x8xf32>
    %82 = arith.mulf %80, %81 : vector<8x8xf32>
    %83 = arith.truncf %82 : vector<8x8xf32> to vector<8x8xbf16>
    %cst_34 = arith.constant -1.000000e+30 : f32
    %84 = vector.broadcast %cst_34 : f32 to vector<8x1xf32>
    %cst_35 = arith.constant 0.000000e+00 : f32
    %85 = vector.broadcast %cst_35 : f32 to vector<8x1xf32>
    %cst_36 = arith.constant 0.000000e+00 : f32
    %86 = vector.broadcast %cst_36 : f32 to vector<8x8xf32>
    %cst_37 = arith.constant -1.000000e+30 : f32
    %c0_i32_38 = arith.constant 0 : i32
    %87 = arith.subi %49, %c0_i32_38 : i32
    %88 = arith.addi %c0_i32_38, %87 : i32
    %c1_i32_39 = arith.constant 1 : i32
    %89:3 = scf.for %arg23 = %c0_i32_38 to %88 step %c1_i32_39 iter_args(%arg24 = %84, %arg25 = %85, %arg26 = %86) -> (vector<8x1xf32>, vector<8x1xf32>, vector<8x8xf32>)  : i32 {
      %180 = arith.index_cast %arg23 : i32 to index
      %c16_82 = arith.constant 16 : index
      %c0_83 = arith.constant 0 : index
      %181 = vector.load %arg20[%180, %c16_82, %c0_83] : memref<1x32x8xbf16, #tpu.memory_space<vmem>>, vector<1x8x8xbf16>
      %182 = vector.shape_cast %181 : vector<1x8x8xbf16> to vector<8x8xbf16>
      %183 = arith.index_cast %arg23 : i32 to index
      %c0_84 = arith.constant 0 : index
      %c16_85 = arith.constant 16 : index
      %184 = vector.load %arg21[%183, %c0_84, %c16_85] : memref<1x8x32xbf16, #tpu.memory_space<vmem>>, vector<1x8x8xbf16>
      %185 = vector.shape_cast %184 : vector<1x8x8xbf16> to vector<8x8xbf16>
      %cst_86 = arith.constant dense<0.000000e+00> : vector<8x8xf32>
      %186 = tpu.matmul %83, %182, %cst_86 {dimension_numbers = #tpu.dot_dimension_numbers<[1], [0], [0], [1], [0, 0, 1, 1], [], []>} : vector<8x8xbf16>, vector<8x8xbf16>, vector<8x8xf32> -> vector<8x8xf32>
      %c8_i32_87 = arith.constant 8 : i32
      %187 = arith.muli %arg23, %c8_i32_87 : i32
      %188 = vector.broadcast %187 : i32 to vector<8x8xi32>
      %189 = arith.addi %188, %48 : vector<8x8xi32>
      %190 = arith.cmpi sle, %189, %47 : vector<8x8xi32>
      %191 = vector.broadcast %cst_37 : f32 to vector<8x8xf32>
      %192 = arith.select %190, %186, %191 : vector<8x8xi1>, vector<8x8xf32>
      %cst_88 = arith.constant dense<0xFF800000> : vector<8xf32>
      %193 = vector.multi_reduction <maximumf>, %192, %cst_88 [1] : vector<8x8xf32> to vector<8xf32>
      %194 = vector.shape_cast %193 : vector<8xf32> to vector<8x1xf32>
      %195 = arith.maximumf %arg24, %194 : vector<8x1xf32>
      %196 = vector.broadcast %195 : vector<8x1xf32> to vector<8x8xf32>
      %197 = arith.subf %192, %196 : vector<8x8xf32>
      %198 = math.exp %197 : vector<8x8xf32>
      %199 = arith.subf %arg24, %195 : vector<8x1xf32>
      %200 = math.exp %199 : vector<8x1xf32>
      %201 = arith.mulf %200, %arg25 : vector<8x1xf32>
      %cst_89 = arith.constant dense<0.000000e+00> : vector<8xf32>
      %202 = vector.multi_reduction <add>, %198, %cst_89 [1] : vector<8x8xf32> to vector<8xf32>
      %203 = vector.shape_cast %202 : vector<8xf32> to vector<8x1xf32>
      %204 = arith.addf %201, %203 : vector<8x1xf32>
      %205 = vector.broadcast %200 : vector<8x1xf32> to vector<8x8xf32>
      %206 = arith.mulf %205, %arg26 : vector<8x8xf32>
      %207 = arith.truncf %198 : vector<8x8xf32> to vector<8x8xbf16>
      %cst_90 = arith.constant dense<0.000000e+00> : vector<8x8xf32>
      %208 = tpu.matmul %207, %185, %cst_90 {dimension_numbers = #tpu.dot_dimension_numbers<[1], [0], [0], [1], [0, 0, 1, 1], [], []>} : vector<8x8xbf16>, vector<8x8xbf16>, vector<8x8xf32> -> vector<8x8xf32>
      %209 = arith.addf %206, %208 : vector<8x8xf32>
      scf.yield %195, %204, %209 : vector<8x1xf32>, vector<8x1xf32>, vector<8x8xf32>
    }
    %90 = tpu.reciprocal %89#1 {approx = true} : vector<8x1xf32> -> vector<8x1xf32>
    %91 = vector.broadcast %90 : vector<8x1xf32> to vector<8x8xf32>
    %92 = arith.mulf %89#2, %91 : vector<8x8xf32>
    %93 = arith.truncf %92 : vector<8x8xf32> to vector<8x8xbf16>
    %c0_40 = arith.constant 0 : index
    %c16 = arith.constant 16 : index
    %94 = vector.load %arg22[%c0_40, %c16] : memref<8x32xbf16, #tpu.memory_space<vmem>>, vector<8x8xbf16>
    tpu.vector_store %arg22[%c0_40, %c16], %93 {strides = array<i32>} : memref<8x32xbf16, #tpu.memory_space<vmem>>, vector<8x8xbf16>,
    %95 = vector.extract_strided_slice %43 {offsets = [0, 24], sizes = [8, 8], strides = [1, 1]} : vector<8x32xf32> to vector<8x8xf32>
    %cst_41 = arith.constant 0.353553385 : f32
    %96 = vector.broadcast %cst_41 : f32 to vector<8x8xf32>
    %97 = arith.mulf %95, %96 : vector<8x8xf32>
    %98 = arith.truncf %97 : vector<8x8xf32> to vector<8x8xbf16>
    %cst_42 = arith.constant -1.000000e+30 : f32
    %99 = vector.broadcast %cst_42 : f32 to vector<8x1xf32>
    %cst_43 = arith.constant 0.000000e+00 : f32
    %100 = vector.broadcast %cst_43 : f32 to vector<8x1xf32>
    %cst_44 = arith.constant 0.000000e+00 : f32
    %101 = vector.broadcast %cst_44 : f32 to vector<8x8xf32>
    %cst_45 = arith.constant -1.000000e+30 : f32
    %c0_i32_46 = arith.constant 0 : i32
    %102 = arith.subi %49, %c0_i32_46 : i32
    %103 = arith.addi %c0_i32_46, %102 : i32
    %c1_i32_47 = arith.constant 1 : i32
    %104:3 = scf.for %arg23 = %c0_i32_46 to %103 step %c1_i32_47 iter_args(%arg24 = %99, %arg25 = %100, %arg26 = %101) -> (vector<8x1xf32>, vector<8x1xf32>, vector<8x8xf32>)  : i32 {
      %180 = arith.index_cast %arg23 : i32 to index
      %c24_82 = arith.constant 24 : index
      %c0_83 = arith.constant 0 : index
      %181 = vector.load %arg20[%180, %c24_82, %c0_83] : memref<1x32x8xbf16, #tpu.memory_space<vmem>>, vector<1x8x8xbf16>
      %182 = vector.shape_cast %181 : vector<1x8x8xbf16> to vector<8x8xbf16>
      %183 = arith.index_cast %arg23 : i32 to index
      %c0_84 = arith.constant 0 : index
      %c24_85 = arith.constant 24 : index
      %184 = vector.load %arg21[%183, %c0_84, %c24_85] : memref<1x8x32xbf16, #tpu.memory_space<vmem>>, vector<1x8x8xbf16>
      %185 = vector.shape_cast %184 : vector<1x8x8xbf16> to vector<8x8xbf16>
      %cst_86 = arith.constant dense<0.000000e+00> : vector<8x8xf32>
      %186 = tpu.matmul %98, %182, %cst_86 {dimension_numbers = #tpu.dot_dimension_numbers<[1], [0], [0], [1], [0, 0, 1, 1], [], []>} : vector<8x8xbf16>, vector<8x8xbf16>, vector<8x8xf32> -> vector<8x8xf32>
      %c8_i32_87 = arith.constant 8 : i32
      %187 = arith.muli %arg23, %c8_i32_87 : i32
      %188 = vector.broadcast %187 : i32 to vector<8x8xi32>
      %189 = arith.addi %188, %48 : vector<8x8xi32>
      %190 = arith.cmpi sle, %189, %47 : vector<8x8xi32>
      %191 = vector.broadcast %cst_45 : f32 to vector<8x8xf32>
      %192 = arith.select %190, %186, %191 : vector<8x8xi1>, vector<8x8xf32>
      %cst_88 = arith.constant dense<0xFF800000> : vector<8xf32>
      %193 = vector.multi_reduction <maximumf>, %192, %cst_88 [1] : vector<8x8xf32> to vector<8xf32>
      %194 = vector.shape_cast %193 : vector<8xf32> to vector<8x1xf32>
      %195 = arith.maximumf %arg24, %194 : vector<8x1xf32>
      %196 = vector.broadcast %195 : vector<8x1xf32> to vector<8x8xf32>
      %197 = arith.subf %192, %196 : vector<8x8xf32>
      %198 = math.exp %197 : vector<8x8xf32>
      %199 = arith.subf %arg24, %195 : vector<8x1xf32>
      %200 = math.exp %199 : vector<8x1xf32>
      %201 = arith.mulf %200, %arg25 : vector<8x1xf32>
      %cst_89 = arith.constant dense<0.000000e+00> : vector<8xf32>
      %202 = vector.multi_reduction <add>, %198, %cst_89 [1] : vector<8x8xf32> to vector<8xf32>
      %203 = vector.shape_cast %202 : vector<8xf32> to vector<8x1xf32>
      %204 = arith.addf %201, %203 : vector<8x1xf32>
      %205 = vector.broadcast %200 : vector<8x1xf32> to vector<8x8xf32>
      %206 = arith.mulf %205, %arg26 : vector<8x8xf32>
      %207 = arith.truncf %198 : vector<8x8xf32> to vector<8x8xbf16>
      %cst_90 = arith.constant dense<0.000000e+00> : vector<8x8xf32>
      %208 = tpu.matmul %207, %185, %cst_90 {dimension_numbers = #tpu.dot_dimension_numbers<[1], [0], [0], [1], [0, 0, 1, 1], [], []>} : vector<8x8xbf16>, vector<8x8xbf16>, vector<8x8xf32> -> vector<8x8xf32>
      %209 = arith.addf %206, %208 : vector<8x8xf32>
      scf.yield %195, %204, %209 : vector<8x1xf32>, vector<8x1xf32>, vector<8x8xf32>
    }
    %105 = tpu.reciprocal %104#1 {approx = true} : vector<8x1xf32> -> vector<8x1xf32>
    %106 = vector.broadcast %105 : vector<8x1xf32> to vector<8x8xf32>
    %107 = arith.mulf %104#2, %106 : vector<8x8xf32>
    %108 = arith.truncf %107 : vector<8x8xf32> to vector<8x8xbf16>
    %c0_48 = arith.constant 0 : index
    %c24 = arith.constant 24 : index
    %109 = vector.load %arg22[%c0_48, %c24] : memref<8x32xbf16, #tpu.memory_space<vmem>>, vector<8x8xbf16>
    tpu.vector_store %arg22[%c0_48, %c24], %108 {strides = array<i32>} : memref<8x32xbf16, #tpu.memory_space<vmem>>, vector<8x8xbf16>,
    %c0_49 = arith.constant 0 : index
    %c0_50 = arith.constant 0 : index
    %110 = vector.load %arg22[%c0_49, %c0_50] : memref<8x32xbf16, #tpu.memory_space<vmem>>, vector<8x32xbf16>
    %c0_51 = arith.constant 0 : index
    %c0_52 = arith.constant 0 : index
    %111 = vector.load %arg11[%c0_51, %c0_52] : memref<32x32xbf16, #tpu.memory_space<vmem>>, vector<32x32xbf16>
    %cst_53 = arith.constant dense<0.000000e+00> : vector<8x32xf32>
    %112 = tpu.matmul %110, %111, %cst_53 {dimension_numbers = #tpu.dot_dimension_numbers<[1], [0], [0], [1], [0, 0, 1, 1], [], []>} : vector<8x32xbf16>, vector<32x32xbf16>, vector<8x32xf32> -> vector<8x32xf32>
    %c0_54 = arith.constant 0 : index
    %c0_55 = arith.constant 0 : index
    %113 = vector.load %arg12[%c0_54, %c0_55] : memref<1x32xf32, #tpu.memory_space<vmem>>, vector<1x32xf32>
    %114 = vector.shape_cast %113 : vector<1x32xf32> to vector<32xf32>
    %115 = vector.shape_cast %114 : vector<32xf32> to vector<1x32xf32>
    %116 = vector.broadcast %115 : vector<1x32xf32> to vector<8x32xf32>
    %117 = arith.addf %112, %116 : vector<8x32xf32>
    %118 = arith.addf %7, %117 : vector<8x32xf32>
    %c0_56 = arith.constant 0 : index
    %c0_57 = arith.constant 0 : index
    %119 = vector.load %arg13[%c0_56, %c0_57] : memref<1x32xf32, #tpu.memory_space<vmem>>, vector<1x32xf32>
    %120 = vector.shape_cast %119 : vector<1x32xf32> to vector<32xf32>
    %c0_58 = arith.constant 0 : index
    %c0_59 = arith.constant 0 : index
    %121 = vector.load %arg14[%c0_58, %c0_59] : memref<1x32xf32, #tpu.memory_space<vmem>>, vector<1x32xf32>
    %122 = vector.shape_cast %121 : vector<1x32xf32> to vector<32xf32>
    %cst_60 = arith.constant dense<0.000000e+00> : vector<8xf32>
    %123 = vector.multi_reduction <add>, %118, %cst_60 [1] : vector<8x32xf32> to vector<8xf32>
    %124 = vector.shape_cast %123 : vector<8xf32> to vector<8x1xf32>
    %cst_61 = arith.constant 3.200000e+01 : f32
    %125 = vector.broadcast %cst_61 : f32 to vector<8x1xf32>
    %126 = arith.divf %124, %125 : vector<8x1xf32>
    %127 = vector.broadcast %126 : vector<8x1xf32> to vector<8x32xf32>
    %128 = arith.subf %118, %127 : vector<8x32xf32>
    %129 = arith.mulf %128, %128 : vector<8x32xf32>
    %cst_62 = arith.constant dense<0.000000e+00> : vector<8xf32>
    %130 = vector.multi_reduction <add>, %129, %cst_62 [1] : vector<8x32xf32> to vector<8xf32>
    %131 = vector.shape_cast %130 : vector<8xf32> to vector<8x1xf32>
    %cst_63 = arith.constant 3.200000e+01 : f32
    %132 = vector.broadcast %cst_63 : f32 to vector<8x1xf32>
    %133 = arith.divf %131, %132 : vector<8x1xf32>
    %134 = vector.broadcast %126 : vector<8x1xf32> to vector<8x32xf32>
    %135 = arith.subf %118, %134 : vector<8x32xf32>
    %cst_64 = arith.constant 9.99999974E-6 : f32
    %136 = vector.broadcast %cst_64 : f32 to vector<8x1xf32>
    %137 = arith.addf %133, %136 : vector<8x1xf32>
    %138 = math.rsqrt %137 : vector<8x1xf32>
    %139 = vector.broadcast %138 : vector<8x1xf32> to vector<8x32xf32>
    %140 = arith.mulf %135, %139 : vector<8x32xf32>
    %141 = vector.shape_cast %120 : vector<32xf32> to vector<1x32xf32>
    %142 = vector.broadcast %141 : vector<1x32xf32> to vector<8x32xf32>
    %143 = arith.mulf %140, %142 : vector<8x32xf32>
    %144 = vector.shape_cast %122 : vector<32xf32> to vector<1x32xf32>
    %145 = vector.broadcast %144 : vector<1x32xf32> to vector<8x32xf32>
    %146 = arith.addf %143, %145 : vector<8x32xf32>
    %147 = arith.truncf %146 : vector<8x32xf32> to vector<8x32xbf16>
    %c0_65 = arith.constant 0 : index
    %c0_66 = arith.constant 0 : index
    %148 = vector.load %arg15[%c0_65, %c0_66] : memref<32x128xbf16, #tpu.memory_space<vmem>>, vector<32x128xbf16>
    %cst_67 = arith.constant dense<0.000000e+00> : vector<8x128xf32>
    %149 = tpu.matmul %147, %148, %cst_67 {dimension_numbers = #tpu.dot_dimension_numbers<[1], [0], [0], [1], [0, 0, 1, 1], [], []>} : vector<8x32xbf16>, vector<32x128xbf16>, vector<8x128xf32> -> vector<8x128xf32>
    %c0_68 = arith.constant 0 : index
    %c0_69 = arith.constant 0 : index
    %150 = vector.load %arg16[%c0_68, %c0_69] : memref<1x128xf32, #tpu.memory_space<vmem>>, vector<1x128xf32>
    %151 = vector.shape_cast %150 : vector<1x128xf32> to vector<128xf32>
    %152 = vector.shape_cast %151 : vector<128xf32> to vector<1x128xf32>
    %153 = vector.broadcast %152 : vector<1x128xf32> to vector<8x128xf32>
    %154 = arith.addf %149, %153 : vector<8x128xf32>
    %cst_70 = arith.constant 5.000000e-01 : f32
    %155 = vector.broadcast %cst_70 : f32 to vector<8x128xf32>
    %156 = arith.mulf %155, %154 : vector<8x128xf32>
    %cst_71 = arith.constant 4.471500e-02 : f32
    %157 = vector.broadcast %cst_71 : f32 to vector<8x128xf32>
    %158 = arith.mulf %157, %154 : vector<8x128xf32>
    %159 = arith.mulf %158, %154 : vector<8x128xf32>
    %160 = arith.mulf %159, %154 : vector<8x128xf32>
    %161 = arith.addf %154, %160 : vector<8x128xf32>
    %cst_72 = arith.constant 0.797884583 : f32
    %162 = vector.broadcast %cst_72 : f32 to vector<8x128xf32>
    %163 = arith.mulf %162, %161 : vector<8x128xf32>
    %164 = math.tanh %163 : vector<8x128xf32>
    %cst_73 = arith.constant 1.000000e+00 : f32
    %165 = vector.broadcast %cst_73 : f32 to vector<8x128xf32>
    %166 = arith.addf %165, %164 : vector<8x128xf32>
    %167 = arith.mulf %156, %166 : vector<8x128xf32>
    %168 = arith.truncf %167 : vector<8x128xf32> to vector<8x128xbf16>
    %c0_74 = arith.constant 0 : index
    %c0_75 = arith.constant 0 : index
    %169 = vector.load %arg17[%c0_74, %c0_75] : memref<128x32xbf16, #tpu.memory_space<vmem>>, vector<128x32xbf16>
    %cst_76 = arith.constant dense<0.000000e+00> : vector<8x32xf32>
    %170 = tpu.matmul %168, %169, %cst_76 {dimension_numbers = #tpu.dot_dimension_numbers<[1], [0], [0], [1], [0, 0, 1, 1], [], []>} : vector<8x128xbf16>, vector<128x32xbf16>, vector<8x32xf32> -> vector<8x32xf32>
    %c0_77 = arith.constant 0 : index
    %c0_78 = arith.constant 0 : index
    %171 = vector.load %arg18[%c0_77, %c0_78] : memref<1x32xf32, #tpu.memory_space<vmem>>, vector<1x32xf32>
    %172 = vector.shape_cast %171 : vector<1x32xf32> to vector<32xf32>
    %173 = vector.shape_cast %172 : vector<32xf32> to vector<1x32xf32>
    %174 = vector.broadcast %173 : vector<1x32xf32> to vector<8x32xf32>
    %175 = arith.addf %170, %174 : vector<8x32xf32>
    %176 = arith.addf %118, %175 : vector<8x32xf32>
    %c0_79 = arith.constant 0 : index
    %c0_80 = arith.constant 0 : index
    %c0_81 = arith.constant 0 : index
    %177 = vector.load %arg19[%c0_79, %c0_80, %c0_81] : memref<1x8x32xf32, #tpu.memory_space<vmem>>, vector<1x8x32xf32>
    %178 = vector.shape_cast %177 : vector<1x8x32xf32> to vector<8x32xf32>
    %179 = vector.shape_cast %176 : vector<8x32xf32> to vector<1x8x32xf32>
    tpu.vector_store %arg19[%c0_79, %c0_80, %c0_81], %179 {strides = array<i32>} : memref<1x8x32xf32, #tpu.memory_space<vmem>>, vector<1x8x32xf32>,
    return
  }
  func.func @transform_0(%arg0: i32, %arg1: i32) -> (i32, i32, i32) {
    %c0_i32 = arith.constant 0 : i32
    %c0_i32_0 = arith.constant 0 : i32
    %c0_i32_1 = arith.constant 0 : i32
    return %arg0, %c0_i32, %c0_i32_0 : i32, i32, i32
  }
  func.func @transform_1(%arg0: i32, %arg1: i32) -> (i32, i32) {
    %c0_i32 = arith.constant 0 : i32
    %c0_i32_0 = arith.constant 0 : i32
    %c0_i32_1 = arith.constant 0 : i32
    return %c0_i32, %c0_i32_0 : i32, i32
  }
  func.func @transform_2(%arg0: i32, %arg1: i32) -> (i32, i32) {
    %c0_i32 = arith.constant 0 : i32
    %c0_i32_0 = arith.constant 0 : i32
    %c0_i32_1 = arith.constant 0 : i32
    return %c0_i32, %c0_i32_0 : i32, i32
  }
  func.func @transform_3(%arg0: i32, %arg1: i32) -> (i32, i32) {
    %c0_i32 = arith.constant 0 : i32
    %c0_i32_0 = arith.constant 0 : i32
    %c0_i32_1 = arith.constant 0 : i32
    return %c0_i32, %c0_i32_0 : i32, i32
  }
  func.func @transform_4(%arg0: i32, %arg1: i32) -> (i32, i32) {
    %c0_i32 = arith.constant 0 : i32
    %c0_i32_0 = arith.constant 0 : i32
    %c0_i32_1 = arith.constant 0 : i32
    return %c0_i32, %c0_i32_0 : i32, i32
  }
  func.func @transform_5(%arg0: i32, %arg1: i32) -> (i32, i32) {
    %c0_i32 = arith.constant 0 : i32
    %c0_i32_0 = arith.constant 0 : i32
    %c0_i32_1 = arith.constant 0 : i32
    return %c0_i32, %c0_i32_0 : i32, i32
  }
  func.func @transform_6(%arg0: i32, %arg1: i32) -> (i32, i32) {
    %c0_i32 = arith.constant 0 : i32
    %c0_i32_0 = arith.constant 0 : i32
    %c0_i32_1 = arith.constant 0 : i32
    return %c0_i32, %c0_i32_0 : i32, i32
  }
  func.func @transform_7(%arg0: i32, %arg1: i32) -> (i32, i32) {
    %c0_i32 = arith.constant 0 : i32
    %c0_i32_0 = arith.constant 0 : i32
    %c0_i32_1 = arith.constant 0 : i32
    return %c0_i32, %c0_i32_0 : i32, i32
  }
  func.func @transform_8(%arg0: i32, %arg1: i32) -> (i32, i32) {
    %c0_i32 = arith.constant 0 : i32
    %c0_i32_0 = arith.constant 0 : i32
    %c0_i32_1 = arith.constant 0 : i32
    return %c0_i32, %c0_i32_0 : i32, i32
  }
  func.func @transform_9(%arg0: i32, %arg1: i32) -> (i32, i32) {
    %c0_i32 = arith.constant 0 : i32
    %c0_i32_0 = arith.constant 0 : i32
    %c0_i32_1 = arith.constant 0 : i32
    return %c0_i32, %c0_i32_0 : i32, i32
  }
  func.func @transform_10(%arg0: i32, %arg1: i32) -> (i32, i32) {
    %c0_i32 = arith.constant 0 : i32
    %c0_i32_0 = arith.constant 0 : i32
    %c0_i32_1 = arith.constant 0 : i32
    return %c0_i32, %c0_i32_0 : i32, i32
  }
  func.func @transform_11(%arg0: i32, %arg1: i32) -> (i32, i32) {
    %c0_i32 = arith.constant 0 : i32
    %c0_i32_0 = arith.constant 0 : i32
    %c0_i32_1 = arith.constant 0 : i32
    return %c0_i32, %c0_i32_0 : i32, i32
  }
  func.func @transform_12(%arg0: i32, %arg1: i32) -> (i32, i32) {
    %c0_i32 = arith.constant 0 : i32
    %c0_i32_0 = arith.constant 0 : i32
    %c0_i32_1 = arith.constant 0 : i32
    return %c0_i32, %c0_i32_0 : i32, i32
  }
  func.func @transform_13(%arg0: i32, %arg1: i32) -> (i32, i32) {
    %c0_i32 = arith.constant 0 : i32
    %c0_i32_0 = arith.constant 0 : i32
    %c0_i32_1 = arith.constant 0 : i32
    return %c0_i32, %c0_i32_0 : i32, i32
  }
  func.func @transform_14(%arg0: i32, %arg1: i32) -> (i32, i32) {
    %c0_i32 = arith.constant 0 : i32
    %c0_i32_0 = arith.constant 0 : i32
    %c0_i32_1 = arith.constant 0 : i32
    return %c0_i32, %c0_i32_0 : i32, i32
  }
  func.func @transform_15(%arg0: i32, %arg1: i32) -> (i32, i32) {
    %c0_i32 = arith.constant 0 : i32
    %c0_i32_0 = arith.constant 0 : i32
    %c0_i32_1 = arith.constant 0 : i32
    return %c0_i32, %c0_i32_0 : i32, i32
  }
  func.func @transform_16(%arg0: i32, %arg1: i32) -> (i32, i32) {
    %c0_i32 = arith.constant 0 : i32
    %c0_i32_0 = arith.constant 0 : i32
    %c0_i32_1 = arith.constant 0 : i32
    return %c0_i32, %c0_i32_0 : i32, i32
  }
  func.func @transform_17(%arg0: i32, %arg1: i32) -> (i32, i32, i32) {
    %c0_i32 = arith.constant 0 : i32
    %c0_i32_0 = arith.constant 0 : i32
    return %arg0, %arg1, %c0_i32 : i32, i32, i32
  }
}

</mosaic_0001>

<bundles_post_ra>
// kernel: tpu_custom_call.1
= control target key start
LH: loop header
LB: loop body
LE: loop exit
PB: predicated region body
PF: predicated region fallthrough
CT: control target
= control target key end

     0   :  { %s3232_s0 = inlined_call_operand.vmem [shape: f32[2,8,32], index: 0, kind: input, shape index: {}]   ;;  %s3233_s1 = inlined_call_operand.vmem [shape: f32[1,32], index: 1, kind: input, shape index: {}]   ;;  %s3234_s2 = inlined_call_operand.vmem [shape: f32[1,32], index: 2, kind: input, shape index: {}]   ;;  %s3235_s3 = inlined_call_operand.vmem [shape: bf16[32,32], index: 3, kind: input, shape index: {}]   ;;  %s3236_s4 = inlined_call_operand.vmem [shape: f32[1,32], index: 4, kind: input, shape index: {}]   ;;  %s3237_s5 = inlined_call_operand.vmem [shape: bf16[32,32], index: 5, kind: input, shape index: {}]   ;;  %s3238_s6 = inlined_call_operand.vmem [shape: f32[1,32], index: 6, kind: input, shape index: {}]   ;;  %s3239_s7 = inlined_call_operand.vmem [shape: bf16[32,32], index: 7, kind: input, shape index: {}]   ;;  %s3240_s8 = inlined_call_operand.vmem [shape: f32[1,32], index: 8, kind: input, shape index: {}]   ;;  %s3241_s9 = inlined_call_operand.vmem [shape: bf16[32,32], index: 9, kind: input, shape index: {}]   ;;  %s3242_s10 = inlined_call_operand.vmem [shape: f32[1,32], index: 10, kind: input, shape index: {}]   ;;  %s3243_s11 = inlined_call_operand.vmem [shape: f32[1,32], index: 11, kind: input, shape index: {}]   ;;  %s3244_s12 = inlined_call_operand.vmem [shape: f32[1,32], index: 12, kind: input, shape index: {}]   ;;  %s3245_s13 = inlined_call_operand.hbm [shape: bf16[32,128], index: 13, kind: input, shape index: {}]   ;;  %s3246_s14 = inlined_call_operand.vmem [shape: f32[1,128], index: 14, kind: input, shape index: {}]   ;;  %s3247_s15 = inlined_call_operand.vmem [shape: bf16[128,32], index: 15, kind: input, shape index: {}]   ;;  %s3248_s16 = inlined_call_operand.vmem [shape: f32[1,32], index: 16, kind: input, shape index: {}]   ;;  %s3249_s17 = inlined_call_operand.hbm [shape: f32[2,8,32], index: 17, kind: output, shape index: {}]  }
   0x1   :  { %3258 = sst [smem:[#allocation18_spill]] %s3232_s0 }
   0x2   :  { %3259 = sst [smem:[#allocation19_spill]] %s3233_s1 }
   0x3   :  { %3260 = sst [smem:[#allocation20_spill]] %s3249_s17 }
   0x4   :  { %22 = vsyncpa [#allocation6], 0 }
   0x5   :  { %23 = vsyncpa [#allocation7], 0 }
   0x6   :  { %25 = vsyncpa [#allocation7 + $0x1], 0  ;;  %s2808_s24 = smov 0   ;;  %s2810_s25 = smov 0  }
   0x7   :  { %s2812_s26 = smov 0   ;;  %s2814_s27 = smov 0  }
   0x8   :  { %s2816_s28 = smov 0   ;;  %s2818_s29 = smov 0  }
   0x9 LB: > { %3261 = sst [smem:[#allocation11_spill]] %s2612_s24  ;;  %s1956_s0 = sadd.s32 4294967295, %s2632_s29   ;;  %s2632_s29 = sphi %s2818_s29, %s31_s29   ;;  %s2628_s28 = sphi %s2816_s28, %s3293_s28   ;;  %s2624_s27 = sphi %s2814_s27, %s3292_s27   ;;  %s2620_s26 = sphi %s2812_s26, %s3291_s26   ;;  %s2616_s25 = sphi %s2810_s25, %s3295_s25   ;;  %s2612_s24 = sphi %s2808_s24, %s3294_s24  }
   0xa   : > { %3262 = sst [smem:[#allocation12_spill]] %s2620_s26  ;;  %s1957_s30 = sadd.s32 4294967294, %s2632_s29  }
   0xb   : > { %3263 = sst [smem:[#allocation13_spill]] %s2628_s28  ;;  %s43_s18 = sadd.s32 1, %s2628_s28 }
   0xc   : > { %3264 = sst [smem:[#allocation14_spill]] %s2632_s29  ;;  %s414_s19 = sadd.s32 1, %s2620_s26 }
   0xd   : > { %p45_p0 = scmp.ge.s32.totalorder %s43_s18, 2  ;;  %p424_p1 = scmp.ne.s32.totalorder %s2620_s26, %s2616_s25 }
   0xe   : > { %p425_p2 = scmp.eq.s32.totalorder %s1956_s0, 1  ;;  %p430_p3 = scmp.ne.s32.totalorder %s2616_s25, %s2612_s24 }
   0xf   : > { %s3297_s18 = smov (%p45_p0, %s43_s18), 0  ;;  %p431_p5 = scmp.eq.s32.totalorder %s1957_s30, 1 }
  0x10   : > { %3265 = sst [smem:[#allocation15_spill]] %s3297_s18  ;;  %p2848_p4 = por %p425_p2, %p424_p1 }
  0x11   : > { %s409_s20 = ssub.s32 %s2628_s28, %s3297_s18  ;;  %p1958_p6 = scmp.ge.s32.totalorder %s2632_s29, 1 }
  0x12   : > { %p412_p7 = scmp.eq.s32.totalorder %s409_s20, 0  ;;  %p2855_p8 = por %p431_p5, %p430_p3 }
  0x13   : > { %p438_p9 = scmp.lt.s32.totalorder %s2632_s29, 3  ;;  %p2867_p11 = scmp.eq.s32.totalorder %s1956_s0, 0 }
  0x14   : > { %s3267_s21 = scalar_select %p2855_p8, 1, 0 }
  0x15   : > { %s2861_s22 = scalar_select %p412_p7, %s2620_s26, %s414_s19  }
  0x16   : > { %3268 = sst [smem:[#allocation16_spill]] %s3267_s21  ;;  %p2863_p10 = pnand %p1958_p6, %p438_p9 }
  0x17   : > { %3269 = sst [smem:[#allocation17_spill]] %s2861_s22  ;;  %s2698_s30 = smov [#allocation5]  }
  0x18   : > { %p2203_p12 = pneg %p2863_p10  ;;  %s486_s20 = sshll.u32 %s2698_s30, 4  ;;  %s487_s20 = int_to_ptr.vmem [resolvable:$true] %s486_s20 }
  0x19   : > { %s2473_s19 = scalar_lea.vmem %s487_s20, 256  ;;  %p2481_p5 = scmp.lt.s32.totalorder %s487_s20, %s487_s20 }
  0x1a   : > { %p2204_p13 = pnand %p2867_p11, %p2203_p12  ;;  %p2474_p1 = scmp.ne.s32.totalorder %s487_s20, %s2473_s19 }
  0x1b   : > { %p2482_p6 = scmp.lt.s32.totalorder %s2473_s19, %s2473_s19 }
  0x1c   : > { %p2464_p0 = pneg %p2204_p13 }
  0x1d   : > { %p2483_p7 = por %p2482_p6, %p2481_p5 }
  0x1e   : > { %p2476_p2 = pnand %p2474_p1, %p2464_p0 }
  0x20   : > { %p2477_p3 = pneg %p2476_p2 }
  0x22   : > { %p2484_p9 = pnand %p2483_p7, %p2477_p3 }
  0x24   : > { %2487 = shalt.err (!%p2484_p9)
}
  0x25   : > { %s2699_s0 = smov 64   ;;  %s2700_s18 = smov 4  }
  0x26   : > { %2206 = dma.hbm_to_vmem [thread:$0]  (!%p2204_p13), %s3245_s13, 256, %s487_s20, [#allocation6], %s2699_s0, %s2699_s0, %s2700_s18  }
  0x27   : > { %518 = sbr.rel (%p2863_p10) target bundleno = 4572 (0x11dc), region = 88 }
  0x2c   : > { %2603 = dma.done.wait (%p2867_p11), [#allocation6], 256  }
  0x2d   : > { %2605 = vsyncadd (%p2867_p11), [#allocation6], 4294967040  ;;  %p569_p12 = scmp.lt.s32.totalorder %s2624_s27, 1  ;;  %s3272_s29 = sld [smem:[#allocation18_spill]]  ;;  %vm581_vm0 = vcmask 261120   ;;  %v2409_v12 = vld [vmem:[%s3237_s5 + $0x8] sm:$0xff]   ;;  %v897_v56 = vlaneseq }
  0x2e   : > { %v2410_v13 = vld [vmem:[%s3239_s7 + $0x8] sm:$0xff]   ;;  %v2701_v14 = vmov 0.0   ;;  %v2411_v15 = vld [vmem:[%s3237_s5] sm:$0xff]   ;;  %s566_s23 = sand.u32 1, %s2616_s25   ;;  %vm2702_vm1 = vmmov 0   ;;  %vm794_vm2 = vcmask 257024  }
  0x2f   : > { %s570_s30 = scalar_select %p569_p12, %s2624_s27, 1  ;;  %2089 = vmatprep.subr.bf16.mxu0 %v2701_v14  ;;  %2097 = vmatprep.subr.bf16.mxu1 %v2701_v14  ;;  %v2412_v16 = vld [vmem:[%s3239_s7] sm:$0xff]   ;;  %v2413_v31 = vld [vmem:[%s3235_s3 + $0x8] sm:$0xff]   ;;  %v2952_v59 = vshrl.u32 %v897_v56, 7  ;;  %v2954_v60 = vand.u32 127, %v897_v56  ;;  %vm788_vm3 = vcmask 60416  }
  0x30   : > { %2090 = vmatpush3.bf16.msra.mxu0 %v2409_v12  ;;  %2098 = vmatpush3.bf16.msra.mxu1 %v2410_v13  ;;  %s2916_s20 = sshll.u32 %s566_s23, 3  ;;  %v1966_v26 = vld [vmem:[%s3234_s2] ss:$0 sm:$0xff]  ;;  %s2967_s26 = smov 0  }
  0x31   : > { %s1964_s19 = sshll.u32 %s570_s30, 3  ;;  %2091 = vmatprep.subr.bf16.mxu0 %v2701_v14  ;;  %2099 = vmatprep.subr.bf16.mxu1 %v2701_v14  ;;  %v2414_v34 = vld [vmem:[%s3235_s3] sm:$0xff]   ;;  %s568_s24 = scalar_lea.vmem [#allocation8], %s2916_s20 }
  0x32   : > { %2093 = vmatprep.mubr.msk.bf16.mxu0 %vm2702_vm1, %v2701_v14  ;;  %2101 = vmatprep.mubr.msk.bf16.mxu1 %vm2702_vm1, %v2701_v14  ;;  %v1967_v37 = vld [vmem:[%s3238_s6] ss:$0 sm:$0xff] }
  0x33   : > { %s572_s17 = scalar_lea.vmem %s3272_s29, %s1964_s19  ;;  %s3273_s19 = sld [smem:[#allocation19_spill]]  ;;  %v1971_v38 = vld [vmem:[%s3240_s8] ss:$0 sm:$0xff] }
  0x34   : > { %v2889_v0 = vld [vmem:[%s572_s17] sm:$0xff]  ;;  %2092 = vmatpush3.bf16.msra.mxu0 %v2411_v15  ;;  %2100 = vmatpush3.bf16.msra.mxu1 %v2412_v16 }
  0x35   : > { %v582_v1 = vsel %vm581_vm0, %v2889_v0, 0.0  ;;  %2105 = vmatprep.subr.bf16.mxu0 %v2701_v14  ;;  %v1981_v50 = vld [vmem:[%s3236_s4] ss:$0 sm:$0xff] }
  0x36   : > { %583 = vadd.xlane.f32.xlu0 %v582_v1 }
  0x39   : > { %v1965_v24 = vld [vmem:[%s3273_s19] ss:$0 sm:$0xff] }
  0x3a   : > { %803 = vadd.xlane.f32.xlu0 %v582_v1 }
  0xbf   : > { %v584_v2 = vpop.xlane.xlu0 %583 }
  0xc0   : > { %v586_v3 = vmul.f32 0.03125, %v584_v2 }
  0xc2   : > { %v587_v4 = vsub.f32 %v2889_v0, %v586_v3 }
  0xc3   : > { %v804_v5 = vpop.xlane.xlu0 %803 }
  0xc4   : > { %v806_v6 = vmul.f32 0.03125, %v804_v5  ;;  %v588_v7 = vmul.f32 %v587_v4, %v587_v4 }
  0xc6   : > { %v807_v8 = vsub.f32 %v2889_v0, %v806_v6  ;;  %v589_v9 = vsel %vm581_vm0, %v588_v7, 0.0  ;;  %v2961_v6 = vmov 0.0   ;;  %v2963_v7 = vmov 0.0  }
  0xc7   : > { %590 = vadd.xlane.f32.xlu1 %v589_v9 }
  0xc8   : > { %v808_v10 = vmul.f32 %v807_v8, %v807_v8 }
  0xca   : > { %v809_v11 = vsel %vm581_vm0, %v808_v10, 0.0 }
  0xcb   : > { %810 = vadd.xlane.f32.xlu1 %v809_v11 }
 0x150   : > { %v591_v17 = vpop.xlane.xlu1 %590 }
 0x151   : > { %v592_v18 = vmul.f32 0.03125, %v591_v17 }
 0x153   : > { %v593_v19 = vadd.f32 1e-05, %v592_v18 }
 0x154   : > { %v811_v20 = vpop.xlane.xlu1 %810 }
 0x155   : > { %2415 = vrsqrt.f32 %v593_v19  ;;  %v812_v21 = vmul.f32 0.03125, %v811_v20 }
 0x157   : > { %v813_v22 = vadd.f32 1e-05, %v812_v21 }
 0x159   : > { %2417 = vrsqrt.f32 %v813_v22 }
 0x162   : > { %v2416_v23 = vpop.eup %2415 }
 0x163   : > { %v595_v25 = vmul.f32 %v2416_v23, %v587_v4 }
 0x165   : > { %v602_v27 = vmul.f32 %v1965_v24, %v595_v25 }
 0x166   : > { %v2418_v28 = vpop.eup %2417 }
 0x167   : > { %v815_v29 = vmul.f32 %v2418_v28, %v807_v8  ;;  %v609_v30 = vadd.f32 %v1966_v26, %v602_v27  ;;  %v2965_v8 = vmov -1e+30  }
 0x169   : > { %v610_v32 = vpack.c.bf16 %v609_v30, %v609_v30  ;;  %v822_v33 = vmul.f32 %v1965_v24, %v815_v29 }
 0x16b   : > { %2094 = vmatmul.mubr.msk.bf16.vlgmr.msra.gmra.mxu0 %vm581_vm0, %v610_v32  ;;  %2102 = vmatmul.mubr.msk.bf16.vlgmr.msra.gmra.mxu1 %vm581_vm0, %v610_v32  ;;  %v829_v35 = vadd.f32 %v1966_v26, %v822_v33 }
 0x16c   : > { %2106 = vmatpush3.bf16.msra.mxu0 %v2413_v31  ;;  %2109 = vmatprep.mubr.msk.bf16.mxu0 %vm2702_vm1, %v2701_v14 }
 0x16d   : > { %2107 = vmatprep.subr.bf16.mxu0 %v2701_v14  ;;  %v830_v36 = vpack.c.bf16 %v829_v35, %v829_v35 }
 0x170   : > { %2108 = vmatpush3.bf16.msra.mxu0 %v2414_v34 }
 0x173   : > { %2110 = vmatmul.mubr.msk.bf16.vlgmr.msra.gmra.mxu0 %vm581_vm0, %v830_v36 }
 0x22b   : > { %v671_v39 = vpop.f32.mrf.mxu0  ;;  %v734_v40 = vpop.f32.mrf.mxu1 }
 0x22c   : > { %v672_v41 = vadd.f32 %v1967_v37, %v671_v39  ;;  %v735_v42 = vadd.f32 %v1971_v38, %v734_v40 }
 0x22d   : > { %v2095_v43 = vpop.f32.mrf.mxu0  ;;  %v2103_v44 = vpop.f32.mrf.mxu1 }
 0x22e   : > { %v793_v45 = vpack.c.bf16 %v735_v42, %v735_v42  ;;  %740 = vxpose.xlu0.b32.start.end [1/1] (short) (narrow) %v672_v41, 32 }
 0x22f   : > { %v674_v46 = vpop.f32.mrf.mxu0  ;;  %v737_v47 = vpop.f32.mrf.mxu1 }
 0x230   : > { %795 = vst.msk [vmem:[#allocation3] sm:$0xf] %vm794_vm2, %v793_v45 }
 0x231   : > { %v2096_v48 = vpop.f32.mrf.mxu0  ;;  %v2104_v49 = vpop.f32.mrf.mxu1 }
 0x233   : > { %v891_v51 = vpop.f32.mrf.mxu0 }
 0x234   : > { %v892_v52 = vadd.f32 %v1981_v50, %v891_v51 }
 0x235   : > { %v2111_v53 = vpop.f32.mrf.mxu0 }
 0x236   : > { %v904_v54 = vmul.f32 0.35355338, %v892_v52 }
 0x237   : > { %v894_v55 = vpop.f32.mrf.mxu0 }
 0x238   : > { %v2950_v57 = vpack.c.bf16 %v904_v54, %v904_v54 }
 0x239   : > { %v2112_v58 = vpop.f32.mrf.mxu0 }
 0x2aa   : > { %v756_v61 = vpop.trf.xlu0 }
 0x2ab   : > { %v2038_v62 = vpack.c.bf16 %v756_v61, %v756_v61 }
 0x2ad   : > { %789 = vst.msk [vmem:[#allocation2] sm:$0xf] %vm788_vm3, %v2038_v62 }
 0x2ae   : > { %v757_v63 = vpop.trf.xlu0 }
 0x2af   : > { %v2039_v1 = vpack.c.bf16 %v757_v63, %v757_v63 }
 0x2b1   : > { %790 = vst.msk [vmem:[#allocation2 + $0x4] sm:$0xf] %vm788_vm3, %v2039_v1 }
 0x2b2   : > { %v758_v2 = vpop.trf.xlu0 }
 0x2b3   : > { %v2040_v3 = vpack.c.bf16 %v758_v2, %v758_v2 }
 0x2b5   : > { %791 = vst.msk [vmem:[#allocation2 + $0x8] sm:$0xf] %vm788_vm3, %v2040_v3 }
 0x2b6   : > { %v759_v4 = vpop.trf.xlu0 }
 0x2b7   : > { %v2041_v5 = vpack.c.bf16 %v759_v4, %v759_v4 }
 0x2b9   : > { %792 = vst.msk [vmem:[#allocation2 + $0xc] sm:$0xf] %vm788_vm3, %v2041_v5 }
 0x2ba LB: >> { %v2703_v9 = vmov 0.0   ;;  %vm2704_vm4 = vmmov 0   ;;  %s2042_s28 = sshll.u32 %s2648_s26, 4  ;;  %vm926_vm5 = vcmask 1043456   ;;  %vm922_vm6 = vcmask 64512   ;;  %s1989_s18 = sshll.u32 %s2648_s26, 3  ;;  %s2648_s26 = sphi %s2967_s26, %s909_s26   ;;  %v2644_v8 = vphi %v2965_v8, %v3276_v8   ;;  %v2640_v7 = vphi %v2963_v7, %v3275_v7   ;;  %v2636_v6 = vphi %v2961_v6, %v3274_v6  }
 0x2bb   : >> { %2113 = vmatprep.subr.bf16.mxu0 %v2703_v9  ;;  %2115 = vmatprep.mubr.msk.bf16.mxu0 %vm2704_vm4, %v2703_v9  ;;  %s917_s29 = scalar_lea.vmem [#allocation2], %s2042_s28  ;;  %v971_v12 = vstv %s1989_s18  ;;  %s1987_s21 = sshll.u32 %s2648_s26, 2 }
 0x2bc   : >> { %2119 = vmatprep.subr.bf16.mxu1 %v2703_v9  ;;  %2121 = vmatprep.mubr.msk.bf16.mxu1 %vm2704_vm4, %v2703_v9  ;;  %v972_v13 = vadd.s32 %v971_v12, %v2954_v60  ;;  %s920_s22 = scalar_lea.vmem [#allocation3], %s1987_s21  ;;  %s909_s26 = sadd.s32 1, %s2648_s26  }
 0x2bd   : >> { %v921_v21 = vld [vmem:[%s920_s22] sm:$0xf]  ;;  %p908_p10 = scmp.ge.s32.totalorder %s909_s26, 1 }
 0x2be   : >> { %vm973_vm7 = vcmp.le.s32.totalorder %v972_v13, %v2952_v59  ;;  %v996_v22 = vsel %vm926_vm5, %v921_v21, 0  ;;  %v2997_v45 = vmov (%p908_p10), 0.0   ;;  %v2999_v46 = vmov (%p908_p10), 0.0   ;;  %s3003_s0 = smov (%p908_p10), 0  }
 0x2bf   : >> { %2120 = vmatpush3.bf16.msra.mxu1 %v996_v22  ;;  %v3001_v47 = vmov (%p908_p10), -1e+30  }
 0x2c0   : >> { %v918_v10 = vld [vmem:[%s917_s29] sm:$0xf] }
 0x2c1   : >> { %v928_v11 = vsel %vm926_vm5, %v918_v10, 0 }
 0x2c2   : >> { %2114 = vmatpush3.bf16.msra.mxu0 %v928_v11 }
 0x2c5   : >> { %2116 = vmatmul.mubr.msk.bf16.vlgmr.msra.gmra.mxu0 %vm922_vm6, %v2950_v57 }
 0x385   : >> { %v964_v15 = vpop.f32.mrf.mxu0 }
 0x386   : >> { %v974_v16 = vsel %vm973_vm7, %v964_v15, -1e+30 }
 0x387   : >> { %v2117_v17 = vpop.f32.mrf.mxu0  ;;  %v975_v18 = vsel %vm922_vm6, %v974_v16, -inf }
 0x388   : >> { %976 = vmax.xlane.f32.xlu0 %v975_v18 }
 0x389   : >> { %v967_v19 = vpop.f32.mrf.mxu0 }
 0x38b   : >> { %v2118_v20 = vpop.f32.mrf.mxu0 }
 0x411   : >> { %v977_v23 = vpop.xlane.xlu0 %976 }
 0x412   : >> { %v978_v24 = vmax.f32 %v2644_v8, %v977_v23  }
 0x414   : >> { %v979_v25 = vsub.f32 %v974_v16, %v978_v24  ;;  %v982_v26 = vsub.f32 %v2644_v8, %v978_v24  ;;  %v3276_v8 = vmov %v978_v24 }
 0x416   : >> { %v980_v27 = vmul.f32 1.442695, %v979_v25  ;;  %v983_v31 = vmul.f32 1.442695, %v982_v26 }
 0x418   : >> { %2419 = vpow2.f32 %v980_v27 }
 0x419   : >> { %2421 = vpow2.f32 %v983_v31 }
 0x425   : >> { %v2420_v28 = vpop.eup %2419 }
 0x426   : >> { %v986_v29 = vsel %vm922_vm6, %v2420_v28, 0.0  ;;  %v991_v30 = vpack.c.bf16 %v2420_v28, %v2420_v28  ;;  %v2422_v32 = vpop.eup %2421 }
 0x427   : >> { %987 = vadd.xlane.f32.xlu0 %v986_v29  ;;  %v985_v33 = vmul.f32 %v2640_v7, %v2422_v32  ;;  %v990_v36 = vmul.f32 %v2636_v6, %v2422_v32 }
 0x428   : >> { %2122 = vmatmul.mubr.msk.bf16.vlgmr.msra.gmra.mxu1 %vm922_vm6, %v991_v30 }
 0x4b0   : >> { %v988_v34 = vpop.xlane.xlu0 %987 }
 0x4b1   : >> { %v989_v35 = vadd.f32 %v988_v34, %v985_v33  }
 0x4b3   : >> { %v3275_v7 = vmov %v989_v35  ;;  %2423 = vrcp.f32 (%p908_p10), %v989_v35 }
 0x4c0   : > { %v2424_v42 = vpop.eup (%p908_p10), %2423 }
 0x4e8   : >> { %v1032_v37 = vpop.f32.mrf.mxu1 }
 0x4e9   : >> { %v1038_v38 = vadd.f32 %v1032_v37, %v990_v36  }
 0x4ea   : >> { %v2123_v39 = vpop.f32.mrf.mxu1  ;;  %911 = sbr.rel (!%p908_p10) target bundleno = 698 (0x2ba), region = 169 }
 0x4eb   : >> { %v3274_v6 = vmov %v1038_v38  ;;  %v1040_v43 = vmul.f32 (%p908_p10), %v2424_v42, %v1038_v38 }
 0x4ec   : >> { %v1035_v40 = vpop.f32.mrf.mxu1 }
 0x4ed   : > { %v1041_v44 = vpack.c.bf16 (%p908_p10), %v1040_v43, %v1040_v43 }
 0x4ee   : >> { %v2124_v41 = vpop.f32.mrf.mxu1 }
 0x4ef   : > { %1043 = vst.msk [vmem:[#allocation4] sm:$0xf] %vm788_vm3, %v1041_v44 }
 0x4f0 LB: >> { %s2705_s30 = smov 120   ;;  %v2706_v48 = vmov 0.0   ;;  %s2043_s19 = sshll.u32 %s2664_s0, 4  ;;  %vm2707_vm8 = vmmov 0   ;;  %s2664_s0 = sphi %s3003_s0, %s1047_s0   ;;  %v2660_v47 = vphi %v3001_v47, %v3279_v47   ;;  %v2656_v46 = vphi %v2999_v46, %v3278_v46   ;;  %v2652_v45 = vphi %v2997_v45, %v3277_v45  }
 0x4f1   : >> { %1061 = vrot.lane.b32.xlu0 %v2950_v57, %s2705_s30  ;;  %2125 = vmatprep.subr.bf16.mxu0 %v2706_v48  ;;  %s1055_s17 = scalar_lea.vmem [#allocation2], %s2043_s19  ;;  %s1993_s26 = sshll.u32 %s2664_s0, 2 }
 0x4f2   : >> { %2127 = vmatprep.mubr.msk.bf16.mxu0 %vm2707_vm8, %v2706_v48  ;;  %2131 = vmatprep.subr.bf16.mxu1 %v2706_v48  ;;  %v1056_v49 = vld [vmem:[%s1055_s17 + $0x4] sm:$0xf]  ;;  %s1058_s28 = scalar_lea.vmem [#allocation3], %s1993_s26  ;;  %s1995_s29 = sshll.u32 %s2664_s0, 3 }
 0x4f3   : >> { %2133 = vmatprep.mubr.msk.bf16.mxu1 %vm2707_vm8, %v2706_v48  ;;  %v1069_v50 = vsel %vm926_vm5, %v1056_v49, 0  ;;  %v2425_v52 = vld [vmem:[%s1058_s28] ss:$0 sps:$4 sm:$0xff]   ;;  %v1112_v53 = vstv %s1995_s29  ;;  %s1047_s0 = sadd.s32 1, %s2664_s0  }
 0x4f4   : >> { %2126 = vmatpush3.bf16.msra.mxu0 %v1069_v50  ;;  %1136 = vrot.lane.b32.xlu1 %v2425_v52, %s2705_s30  ;;  %v1113_v54 = vadd.s32 %v1112_v53, %v2954_v60  ;;  %p1046_p11 = scmp.ge.s32.totalorder %s1047_s0, 1 }
 0x4f5   : > { %s2708_s18 = smov (%p1046_p11), 8   ;;  %vm1194_vm10 = vcmask (%p1046_p11), 126016   ;;  %v3032_v27 = vmov (%p1046_p11), 0.0   ;;  %v3034_v28 = vmov (%p1046_p11), 0.0   ;;  %v3036_v29 = vmov (%p1046_p11), -1e+30  }
 0x4f6   : >> { %vm1114_vm9 = vcmp.le.s32.totalorder %v1113_v54, %v2952_v59  ;;  %s3038_s21 = smov (%p1046_p11), 0  }
 0x563   : >> { %v1062_v51 = vpop.permute.xlu0 %1061 }
 0x564   : >> { %2128 = vmatmul.mubr.msk.bf16.vlgmr.msra.gmra.mxu0 %vm922_vm6, %v1062_v51 }
 0x566   : >> { %v1137_v1 = vpop.permute.xlu1 %1136 }
 0x567   : >> { %v1142_v2 = vsel %vm926_vm5, %v1137_v1, 0 }
 0x568   : >> { %2132 = vmatpush3.bf16.msra.mxu1 %v1142_v2 }
 0x624   : >> { %v1105_v55 = vpop.f32.mrf.mxu0 }
 0x625   : >> { %v1115_v56 = vsel %vm1114_vm9, %v1105_v55, -1e+30 }
 0x626   : >> { %v2129_v58 = vpop.f32.mrf.mxu0  ;;  %v1116_v61 = vsel %vm922_vm6, %v1115_v56, -inf }
 0x627   : >> { %1117 = vmax.xlane.f32.xlu0 %v1116_v61 }
 0x628   : >> { %v1108_v62 = vpop.f32.mrf.mxu0 }
 0x62a   : >> { %v2130_v63 = vpop.f32.mrf.mxu0 }
 0x6b0   : >> { %v1118_v3 = vpop.xlane.xlu0 %1117 }
 0x6b1   : >> { %v1119_v4 = vmax.f32 %v2660_v47, %v1118_v3  }
 0x6b3   : >> { %v1120_v5 = vsub.f32 %v1115_v56, %v1119_v4  ;;  %v1123_v6 = vsub.f32 %v2660_v47, %v1119_v4  ;;  %v3279_v47 = vmov %v1119_v4 }
 0x6b5   : >> { %v1121_v7 = vmul.f32 1.442695, %v1120_v5  ;;  %v1124_v11 = vmul.f32 1.442695, %v1123_v6 }
 0x6b7   : >> { %2426 = vpow2.f32 %v1121_v7 }
 0x6b8   : >> { %2428 = vpow2.f32 %v1124_v11 }
 0x6c4   : >> { %v2427_v8 = vpop.eup %2426 }
 0x6c5   : >> { %v1127_v9 = vsel %vm922_vm6, %v2427_v8, 0.0  ;;  %v1132_v10 = vpack.c.bf16 %v2427_v8, %v2427_v8  ;;  %v2429_v12 = vpop.eup %2428 }
 0x6c6   : >> { %1128 = vadd.xlane.f32.xlu1 %v1127_v9  ;;  %v1126_v13 = vmul.f32 %v2656_v46, %v2429_v12  ;;  %v1131_v17 = vmul.f32 %v2652_v45, %v2429_v12 }
 0x6c7   : >> { %2134 = vmatmul.mubr.msk.bf16.vlgmr.msra.gmra.mxu1 %vm922_vm6, %v1132_v10 }
 0x74f   : >> { %v1129_v15 = vpop.xlane.xlu1 %1128 }
 0x750   : >> { %v1130_v16 = vadd.f32 %v1129_v15, %v1126_v13  }
 0x752   : >> { %v3278_v46 = vmov %v1130_v16  ;;  %2430 = vrcp.f32 (%p1046_p11), %v1130_v16 }
 0x75f   : > { %v2431_v23 = vpop.eup (%p1046_p11), %2430 }
 0x787   : >> { %v1178_v18 = vpop.f32.mrf.mxu1 }
 0x788   : >> { %v1184_v19 = vadd.f32 %v1178_v18, %v1131_v17  }
 0x789   : >> { %v2135_v20 = vpop.f32.mrf.mxu1  ;;  %1049 = sbr.rel (!%p1046_p11) target bundleno = 1264 (0x4f0), region = 180 }
 0x78a   : >> { %v3277_v45 = vmov %v1184_v19  ;;  %v1186_v24 = vmul.f32 (%p1046_p11), %v2431_v23, %v1184_v19 }
 0x78b   : >> { %v1181_v21 = vpop.f32.mrf.mxu1 }
 0x78c   : > { %v2044_v25 = vpack.c.bf16 (%p1046_p11), %v1186_v24, %v1186_v24 }
 0x78d   : >> { %v2136_v22 = vpop.f32.mrf.mxu1 }
 0x78e   : > { %1191 = vrot.lane.b32.xlu0 %v2044_v25, %s2708_s18 }
 0x800   : > { %v1192_v26 = vpop.permute.xlu0 %1191 }
 0x801   : > { %1195 = vst.msk [vmem:[#allocation4] sm:$0xf] %vm1194_vm10, %v1192_v26 }
 0x802 LB: >> { %s2709_s22 = smov 112   ;;  %v2710_v30 = vmov 0.0   ;;  %s2045_s0 = sshll.u32 %s2680_s21, 4  ;;  %vm2711_vm11 = vmmov 0   ;;  %s2680_s21 = sphi %s3038_s21, %s1199_s21   ;;  %v2676_v29 = vphi %v3036_v29, %v3282_v29   ;;  %v2672_v28 = vphi %v3034_v28, %v3281_v28   ;;  %v2668_v27 = vphi %v3032_v27, %v3280_v27  }
 0x803   : >> { %1213 = vrot.lane.b32.xlu0 %v2950_v57, %s2709_s22  ;;  %2137 = vmatprep.subr.bf16.mxu0 %v2710_v30  ;;  %s1207_s30 = scalar_lea.vmem [#allocation2], %s2045_s0  ;;  %s2001_s19 = sshll.u32 %s2680_s21, 2 }
 0x804   : >> { %2139 = vmatprep.mubr.msk.bf16.mxu0 %vm2711_vm11, %v2710_v30  ;;  %2143 = vmatprep.subr.bf16.mxu1 %v2710_v30  ;;  %v1208_v31 = vld [vmem:[%s1207_s30 + $0x8] sm:$0xf]  ;;  %s1210_s17 = scalar_lea.vmem [#allocation3], %s2001_s19  ;;  %s2003_s26 = sshll.u32 %s2680_s21, 3 }
 0x805   : >> { %2145 = vmatprep.mubr.msk.bf16.mxu1 %vm2711_vm11, %v2710_v30  ;;  %v1221_v32 = vsel %vm926_vm5, %v1208_v31, 0  ;;  %v2432_v34 = vld [vmem:[%s1210_s17] ss:$0 sps:$4 sm:$0xff]   ;;  %v1264_v35 = vstv %s2003_s26  ;;  %s1199_s21 = sadd.s32 1, %s2680_s21  }
 0x806   : >> { %2138 = vmatpush3.bf16.msra.mxu0 %v1221_v32  ;;  %1288 = vrot.lane.b32.xlu1 %v2432_v34, %s2709_s22  ;;  %v1265_v36 = vadd.s32 %v1264_v35, %v2954_v60  ;;  %p1198_p13 = scmp.ge.s32.totalorder %s1199_s21, 1 }
 0x807   : > { %s2712_s28 = smov (%p1198_p13), 16   ;;  %vm1346_vm13 = vcmask (%p1198_p13), 191616   ;;  %v3067_v8 = vmov (%p1198_p13), 0.0   ;;  %v3069_v9 = vmov (%p1198_p13), 0.0   ;;  %v3071_v10 = vmov (%p1198_p13), -1e+30  }
 0x808   : >> { %vm1266_vm12 = vcmp.le.s32.totalorder %v1265_v36, %v2952_v59  ;;  %s3073_s29 = smov (%p1198_p13), 0  }
 0x875   : >> { %v1214_v33 = vpop.permute.xlu0 %1213 }
 0x876   : >> { %2140 = vmatmul.mubr.msk.bf16.vlgmr.msra.gmra.mxu0 %vm922_vm6, %v1214_v33 }
 0x878   : >> { %v1289_v43 = vpop.permute.xlu1 %1288 }
 0x879   : >> { %v1294_v44 = vsel %vm926_vm5, %v1289_v43, 0 }
 0x87a   : >> { %2144 = vmatpush3.bf16.msra.mxu1 %v1294_v44 }
 0x936   : >> { %v1257_v37 = vpop.f32.mrf.mxu0 }
 0x937   : >> { %v1267_v38 = vsel %vm1266_vm12, %v1257_v37, -1e+30 }
 0x938   : >> { %v2141_v39 = vpop.f32.mrf.mxu0  ;;  %v1268_v40 = vsel %vm922_vm6, %v1267_v38, -inf }
 0x939   : >> { %1269 = vmax.xlane.f32.xlu0 %v1268_v40 }
 0x93a   : >> { %v1260_v41 = vpop.f32.mrf.mxu0 }
 0x93c   : >> { %v2142_v42 = vpop.f32.mrf.mxu0 }
 0x9c2   : >> { %v1270_v45 = vpop.xlane.xlu0 %1269 }
 0x9c3   : >> { %v1271_v46 = vmax.f32 %v2676_v29, %v1270_v45  }
 0x9c5   : >> { %v1272_v47 = vsub.f32 %v1267_v38, %v1271_v46  ;;  %v1275_v48 = vsub.f32 %v2676_v29, %v1271_v46  ;;  %v3282_v29 = vmov %v1271_v46 }
 0x9c7   : >> { %v1273_v49 = vmul.f32 1.442695, %v1272_v47  ;;  %v1276_v53 = vmul.f32 1.442695, %v1275_v48 }
 0x9c9   : >> { %2433 = vpow2.f32 %v1273_v49 }
 0x9ca   : >> { %2435 = vpow2.f32 %v1276_v53 }
 0x9d6   : >> { %v2434_v50 = vpop.eup %2433 }
 0x9d7   : >> { %v1279_v51 = vsel %vm922_vm6, %v2434_v50, 0.0  ;;  %v1284_v52 = vpack.c.bf16 %v2434_v50, %v2434_v50  ;;  %v2436_v54 = vpop.eup %2435 }
 0x9d8   : >> { %1280 = vadd.xlane.f32.xlu1 %v1279_v51  ;;  %v1278_v55 = vmul.f32 %v2672_v28, %v2436_v54  ;;  %v1283_v61 = vmul.f32 %v2668_v27, %v2436_v54 }
 0x9d9   : >> { %2146 = vmatmul.mubr.msk.bf16.vlgmr.msra.gmra.mxu1 %vm922_vm6, %v1284_v52 }
 0xa61   : >> { %v1281_v56 = vpop.xlane.xlu1 %1280 }
 0xa62   : >> { %v1282_v58 = vadd.f32 %v1281_v56, %v1278_v55  }
 0xa64   : >> { %v3281_v28 = vmov %v1282_v58  ;;  %2437 = vrcp.f32 (%p1198_p13), %v1282_v58 }
 0xa71   : > { %v2438_v4 = vpop.eup (%p1198_p13), %2437 }
 0xa99   : >> { %v1330_v62 = vpop.f32.mrf.mxu1 }
 0xa9a   : >> { %v1336_v63 = vadd.f32 %v1330_v62, %v1283_v61  }
 0xa9b   : >> { %v2147_v1 = vpop.f32.mrf.mxu1  ;;  %1201 = sbr.rel (!%p1198_p13) target bundleno = 2050 (0x802), region = 191 }
 0xa9c   : >> { %v3280_v27 = vmov %v1336_v63  ;;  %v1338_v5 = vmul.f32 (%p1198_p13), %v2438_v4, %v1336_v63 }
 0xa9d   : >> { %v1333_v2 = vpop.f32.mrf.mxu1 }
 0xa9e   : > { %v2046_v6 = vpack.c.bf16 (%p1198_p13), %v1338_v5, %v1338_v5 }
 0xa9f   : >> { %v2148_v3 = vpop.f32.mrf.mxu1 }
 0xaa0   : > { %1343 = vrot.lane.b32.xlu0 %v2046_v6, %s2712_s28 }
 0xb12   : > { %v1344_v7 = vpop.permute.xlu0 %1343 }
 0xb13   : > { %1347 = vst.msk [vmem:[#allocation4] sm:$0xf] %vm1346_vm13, %v1344_v7 }
 0xb14 LB: >> { %s2713_s18 = smov 104   ;;  %v2714_v11 = vmov 0.0   ;;  %s2047_s21 = sshll.u32 %s2696_s29, 4  ;;  %vm2715_vm14 = vmmov 0   ;;  %s2696_s29 = sphi %s3073_s29, %s1351_s29   ;;  %v2692_v10 = vphi %v3071_v10, %v3285_v10   ;;  %v2688_v9 = vphi %v3069_v9, %v3284_v9   ;;  %v2684_v8 = vphi %v3067_v8, %v3283_v8  }
 0xb15   : >> { %1365 = vrot.lane.b32.xlu0 %v2950_v57, %s2713_s18  ;;  %2149 = vmatprep.subr.bf16.mxu0 %v2714_v11  ;;  %s1359_s22 = scalar_lea.vmem [#allocation2], %s2047_s21  ;;  %s2009_s0 = sshll.u32 %s2696_s29, 2 }
 0xb16   : >> { %2151 = vmatprep.mubr.msk.bf16.mxu0 %vm2715_vm14, %v2714_v11  ;;  %2155 = vmatprep.subr.bf16.mxu1 %v2714_v11  ;;  %v1360_v12 = vld [vmem:[%s1359_s22 + $0xc] sm:$0xf]  ;;  %s1362_s30 = scalar_lea.vmem [#allocation3], %s2009_s0  ;;  %s2011_s19 = sshll.u32 %s2696_s29, 3 }
 0xb17   : >> { %2157 = vmatprep.mubr.msk.bf16.mxu1 %vm2715_vm14, %v2714_v11  ;;  %v1373_v13 = vsel %vm926_vm5, %v1360_v12, 0  ;;  %v2439_v16 = vld [vmem:[%s1362_s30] ss:$0 sps:$4 sm:$0xff]   ;;  %v1416_v17 = vstv %s2011_s19  ;;  %s1351_s29 = sadd.s32 1, %s2696_s29  }
 0xb18   : >> { %2150 = vmatpush3.bf16.msra.mxu0 %v1373_v13  ;;  %1440 = vrot.lane.b32.xlu1 %v2439_v16, %s2713_s18  ;;  %v1417_v18 = vadd.s32 %v1416_v17, %v2954_v60  ;;  %p1350_p0 = scmp.ge.s32.totalorder %s1351_s29, 1 }
 0xb19   : > { %2177 = vmatprep.subr.bf16.mxu0 (%p1350_p0), %v2701_v14  ;;  %v2444_v46 = vld [vmem:[%s3241_s9 + $0x8] sm:$0xff] (%p1350_p0)   ;;  %v2445_v47 = vld [vmem:[%s3241_s9] sm:$0xff] (%p1350_p0)   ;;  %s2716_s29 = smov (%p1350_p0), 24   ;;  %vm1498_vm2 = vcmask (%p1350_p0), 257216   ;;  %v2447_v4 = vld [vmem:[#allocation5] sm:$0xff] (%p1350_p0)   ;;  %s2035_s26 = sshll.u32 (%p1350_p0), %s2624_s27, 7 }
 0xb1a   : >> { %vm1418_vm15 = vcmp.le.s32.totalorder %v1417_v18, %v2952_v59  ;;  %v2015_v50 = vld [vmem:[%s3242_s10] ss:$0 sm:$0xff] (%p1350_p0)  ;;  %v2449_v16 = vld [vmem:[%s3247_s15 + $0x30] sm:$0xff] (%p1350_p0)   ;;  %v2450_v17 = vld [vmem:[%s3247_s15 + $0x28] sm:$0xff] (%p1350_p0)   ;;  %s1802_s28 = sshll.u32 (%p1350_p0), %s568_s24, 4  ;;  %s3286_s21 = sld [smem:[#allocation20_spill]] (%p1350_p0)  ;;  %s3183_s28 = int_to_ptr.vmem [resolvable:$true] %s1802_s28 }
 0xb1b   : > { %v2446_v3 = vld [vmem:[#allocation5 + $0x8] sm:$0xff] (%p1350_p0)   ;;  %s1788_s27 = scalar_lea.sflag (%p1350_p0), [#allocation7], %s566_s23  ;;  %s2488_s0 = scalar_lea.vmem (%p1350_p0), %s3183_s28, 128 }
 0xb1c   : > { %v2451_v18 = vld [vmem:[%s3247_s15 + $0x20] sm:$0xff] (%p1350_p0)   ;;  %p2489_p1 = scmp.ne.s32.totalorder (%p1350_p0), %s3183_s28, %s2488_s0  ;;  %s2717_s30 = smov (%p1350_p0), [#allocation8]  }
 0xb1d   : > { %s2492_s19 = sshll.u32 (%p1350_p0), %s2717_s30, 4  ;;  %s2493_s19 = int_to_ptr.vmem [resolvable:$false] %s2492_s19 }
 0xb1e   : > { %p2490_p2 = pnand (%p1350_p0), %p2489_p1, %p2848_p4  ;;  %s2494_s17 = scalar_lea.vmem (%p1350_p0), %s2493_s19, 256 }
 0xb1f   : > { %p2495_p5 = scmp.lt.s32.totalorder (%p1350_p0), %s3183_s28, %s2493_s19  ;;  %p2496_p6 = scmp.lt.s32.totalorder (%p1350_p0), %s2494_s17, %s2488_s0 }
 0xb20   : > { %s3181_s22 = scalar_lea.hbm (%p1350_p0), %s3286_s21, %s2035_s26  ;;  %p2491_p3 = pneg (%p1350_p0), %p2490_p2 }
 0xb21   : > { %p2497_p7 = por (%p1350_p0), %p2496_p6, %p2495_p5 }
 0xb23   : > { %p2498_p9 = pnand (%p1350_p0), %p2497_p7, %p2491_p3 }
 0xb87   : >> { %v1366_v15 = vpop.permute.xlu0 %1365 }
 0xb88   : >> { %2152 = vmatmul.mubr.msk.bf16.vlgmr.msra.gmra.mxu0 %vm922_vm6, %v1366_v15  ;;  %v2448_v15 = vld [vmem:[%s3247_s15 + $0x38] sm:$0xff] (%p1350_p0)  }
 0xb89   : > { %2193 = vmatprep.mubr.msk.bf16.mxu0 (%p1350_p0), %vm2702_vm1, %v2701_v14  ;;  %2178 = vmatpush3.bf16.msra.mxu0 (%p1350_p0), %v2448_v15 }
 0xb8a   : >> { %v1441_v25 = vpop.permute.xlu1 %1440  ;;  %2179 = vmatprep.subr.bf16.mxu0 (%p1350_p0), %v2701_v14 }
 0xb8b   : >> { %v1446_v26 = vsel %vm926_vm5, %v1441_v25, 0 }
 0xb8c   : >> { %2156 = vmatpush3.bf16.msra.mxu1 %v1446_v26 }
 0xb8d   : > { %2161 = vmatprep.subr.bf16.mxu1 (%p1350_p0), %v2701_v14  ;;  %2180 = vmatpush3.bf16.msra.mxu0 (%p1350_p0), %v2449_v16 }
 0xb8e   : > { %2181 = vmatprep.subr.bf16.mxu0 (%p1350_p0), %v2701_v14 }
 0xb91   : > { %2182 = vmatpush3.bf16.msra.mxu0 (%p1350_p0), %v2450_v17 }
 0xb92   : > { %2183 = vmatprep.subr.bf16.mxu0 (%p1350_p0), %v2701_v14 }
 0xb95   : > { %2184 = vmatpush3.bf16.msra.mxu0 (%p1350_p0), %v2451_v18 }
 0xb96   : > { %2185 = vmatprep.subr.bf16.mxu0 (%p1350_p0), %v2701_v14 }
 0xc48   : >> { %v1409_v19 = vpop.f32.mrf.mxu0 }
 0xc49   : >> { %v1419_v20 = vsel %vm1418_vm15, %v1409_v19, -1e+30  ;;  %v2452_v19 = vld [vmem:[%s3247_s15 + $0x18] sm:$0xff] (%p1350_p0)  }
 0xc4a   : >> { %v2153_v21 = vpop.f32.mrf.mxu0  ;;  %v1420_v22 = vsel %vm922_vm6, %v1419_v20, -inf  ;;  %2186 = vmatpush3.bf16.msra.mxu0 (%p1350_p0), %v2452_v19 }
 0xc4b   : >> { %1421 = vmax.xlane.f32.xlu0 %v1420_v22  ;;  %2187 = vmatprep.subr.bf16.mxu0 (%p1350_p0), %v2701_v14  ;;  %v2454_v21 = vld [vmem:[%s3247_s15 + $0x8] sm:$0xff] (%p1350_p0)   ;;  %v2455_v22 = vld [vmem:[%s3247_s15] sm:$0xff] (%p1350_p0)  }
 0xc4c   : >> { %v1412_v23 = vpop.f32.mrf.mxu0 }
 0xc4d   : > { %v2021_v23 = vld [vmem:[%s3246_s14] ss:$0 sm:$0xff] (%p1350_p0) }
 0xc4e   : >> { %v2154_v24 = vpop.f32.mrf.mxu0 }
 0xcd4   : >> { %v1422_v27 = vpop.xlane.xlu0 %1421 }
 0xcd5   : >> { %v1423_v28 = vmax.f32 %v2692_v10, %v1422_v27  }
 0xcd7   : >> { %v1424_v29 = vsub.f32 %v1419_v20, %v1423_v28  ;;  %v1427_v30 = vsub.f32 %v2692_v10, %v1423_v28  ;;  %v3285_v10 = vmov %v1423_v28  ;;  %v2453_v20 = vld [vmem:[%s3247_s15 + $0x10] sm:$0xff] (%p1350_p0)  }
 0xcd8   : > { %v2020_v10 = vld [vmem:[%s3244_s12] ss:$0 sm:$0xff] (%p1350_p0)  ;;  %2188 = vmatpush3.bf16.msra.mxu0 (%p1350_p0), %v2453_v20 }
 0xcd9   : >> { %v1425_v31 = vmul.f32 1.442695, %v1424_v29  ;;  %v1428_v35 = vmul.f32 1.442695, %v1427_v30  ;;  %2189 = vmatprep.subr.bf16.mxu0 (%p1350_p0), %v2701_v14 }
 0xcdb   : >> { %2440 = vpow2.f32 %v1425_v31 }
 0xcdc   : >> { %2442 = vpow2.f32 %v1428_v35  ;;  %2190 = vmatpush3.bf16.msra.mxu0 (%p1350_p0), %v2454_v21 }
 0xcdd   : > { %2191 = vmatprep.subr.bf16.mxu0 (%p1350_p0), %v2701_v14 }
 0xce0   : > { %2192 = vmatpush3.bf16.msra.mxu0 (%p1350_p0), %v2455_v22 }
 0xce8   : >> { %v2441_v32 = vpop.eup %2440 }
 0xce9   : >> { %v1431_v33 = vsel %vm922_vm6, %v2441_v32, 0.0  ;;  %v1436_v34 = vpack.c.bf16 %v2441_v32, %v2441_v32  ;;  %v2443_v36 = vpop.eup %2442 }
 0xcea   : >> { %1432 = vadd.xlane.f32.xlu1 %v1431_v33  ;;  %v1430_v37 = vmul.f32 %v2688_v9, %v2443_v36  ;;  %v1435_v40 = vmul.f32 %v2684_v8, %v2443_v36 }
 0xceb   : >> { %2158 = vmatmul.mubr.msk.bf16.vlgmr.msra.gmra.mxu1 %vm922_vm6, %v1436_v34 }
 0xcec   : > { %2165 = vmatprep.mubr.msk.bf16.mxu1 (%p1350_p0), %vm2702_vm1, %v2701_v14  ;;  %2162 = vmatpush3.bf16.msra.mxu1 (%p1350_p0), %v2444_v46 }
 0xced   : > { %2163 = vmatprep.subr.bf16.mxu1 (%p1350_p0), %v2701_v14 }
 0xcf0   : > { %2164 = vmatpush3.bf16.msra.mxu1 (%p1350_p0), %v2445_v47 }
 0xcf1   : > { %2169 = vmatprep.subr.bf16.mxu1 (%p1350_p0), %v2701_v14 }
 0xd73   : >> { %v1433_v38 = vpop.xlane.xlu1 %1432 }
 0xd74   : >> { %v1434_v39 = vadd.f32 %v1433_v38, %v1430_v37   ;;  %v2025_v38 = vld [vmem:[%s3248_s16] ss:$0 sm:$0xff] (%p1350_p0) }
 0xd76   : >> { %v3284_v9 = vmov %v1434_v39  ;;  %2456 = vrcp.f32 (%p1350_p0), %v1434_v39 }
 0xd83   : > { %v2457_v57 = vpop.eup (%p1350_p0), %2456 }
 0xdab   : >> { %v1482_v41 = vpop.f32.mrf.mxu1 }
 0xdac   : >> { %v1488_v42 = vadd.f32 %v1482_v41, %v1435_v40  }
 0xdad   : >> { %v2159_v43 = vpop.f32.mrf.mxu1  ;;  %1353 = sbr.rel (!%p1350_p0) target bundleno = 2836 (0xb14), region = 202 }
 0xdae   : >> { %v3283_v8 = vmov %v1488_v42  ;;  %v1490_v59 = vmul.f32 (%p1350_p0), %v2457_v57, %v1488_v42 }
 0xdaf   : >> { %v1485_v44 = vpop.f32.mrf.mxu1  ;;  %v2019_v8 = vld [vmem:[%s3243_s11] ss:$0 sm:$0xff] (%p1350_p0) }
 0xdb0   : > { %v2048_v60 = vpack.c.bf16 (%p1350_p0), %v1490_v59, %v1490_v59 }
 0xdb1   : >> { %v2160_v45 = vpop.f32.mrf.mxu1 }
 0xdb2   : > { %1495 = vrot.lane.b32.xlu0 %v2048_v60, %s2716_s29 }
 0xe24   : > { %v1496_v48 = vpop.permute.xlu0 %1495 }
 0xe25   : > { %1499 = vst.msk [vmem:[#allocation4] sm:$0xf] %vm1498_vm2, %v1496_v48 }
 0xe2c   : > { %v1500_v49 = vld [vmem:[#allocation4] sm:$0xf] }
 0xe2d   : > { %2166 = vmatmul.mubr.msk.bf16.vlgmr.msra.gmra.mxu1 %vm581_vm0, %v1500_v49 }
 0xe2e   : > { %2173 = vmatprep.mubr.msk.bf16.mxu1 %vm2702_vm1, %v2701_v14  ;;  %2170 = vmatpush3.bf16.msra.mxu1 %v2446_v3 }
 0xe2f   : > { %2171 = vmatprep.subr.bf16.mxu1 %v2701_v14 }
 0xe32   : > { %2172 = vmatpush3.bf16.msra.mxu1 %v2447_v4 }
 0xeed   : > { %v1561_v51 = vpop.f32.mrf.mxu1 }
 0xeee   : > { %v1562_v52 = vadd.f32 %v2015_v50, %v1561_v51 }
 0xeef   : > { %v2167_v53 = vpop.f32.mrf.mxu1 }
 0xef0   : > { %v3123_v54 = vadd.f32 %v1562_v52, %v2889_v0 }
 0xef1   : > { %v1564_v55 = vpop.f32.mrf.mxu1 }
 0xef2   : > { %v1570_v56 = vsel %vm581_vm0, %v3123_v54, 0.0 }
 0xef3   : > { %1571 = vadd.xlane.f32.xlu0 %v1570_v56  ;;  %v2168_v58 = vpop.f32.mrf.mxu1 }
 0xf7c   : > { %v1572_v61 = vpop.xlane.xlu0 %1571 }
 0xf7d   : > { %v1573_v62 = vmul.f32 0.03125, %v1572_v61 }
 0xf7f   : > { %v1574_v63 = vsub.f32 %v3123_v54, %v1573_v62 }
 0xf81   : > { %v1575_v1 = vmul.f32 %v1574_v63, %v1574_v63 }
 0xf83   : > { %v1576_v2 = vsel %vm581_vm0, %v1575_v1, 0.0 }
 0xf84   : > { %1577 = vadd.xlane.f32.xlu1 %v1576_v2 }
0x100d   : > { %v1578_v0 = vpop.xlane.xlu1 %1577 }
0x100e   : > { %v1579_v5 = vmul.f32 0.03125, %v1578_v0 }
0x1010   : > { %v1580_v6 = vadd.f32 1e-05, %v1579_v5 }
0x1012   : > { %2458 = vrsqrt.f32 %v1580_v6 }
0x101f   : > { %v2459_v7 = vpop.eup %2458 }
0x1020   : > { %v1582_v9 = vmul.f32 %v2459_v7, %v1574_v63 }
0x1022   : > { %v1589_v11 = vmul.f32 %v2019_v8, %v1582_v9 }
0x1024   : > { %v1596_v12 = vadd.f32 %v2020_v10, %v1589_v11 }
0x1026   : > { %v1597_v13 = vpack.c.bf16 %v1596_v12, %v1596_v12 }
0x1028   : > { %2174 = vmatmul.mubr.msk.bf16.vlgmr.msra.gmra.mxu1 %vm581_vm0, %v1597_v13 }
0x10e8   : > { %v1658_v24 = vpop.f32.mrf.mxu1 }
0x10e9   : > { %v1659_v25 = vadd.f32 %v2021_v23, %v1658_v24 }
0x10ea   : > { %v2175_v26 = vpop.f32.mrf.mxu1 }
0x10eb   : > { %v1665_v27 = vmul.f32 0.044715, %v1659_v25  ;;  %v1664_v14 = vmul.f32 0.5, %v1659_v25 }
0x10ec   : > { %v1661_v28 = vpop.f32.mrf.mxu1 }
0x10ed   : > { %v1666_v29 = vmul.f32 %v1665_v27, %v1659_v25 }
0x10ee   : > { %v2176_v30 = vpop.f32.mrf.mxu1 }
0x10ef   : > { %v1667_v31 = vmul.f32 %v1666_v29, %v1659_v25 }
0x10f1   : > { %v1668_v32 = vadd.f32 %v1667_v31, %v1659_v25 }
0x10f3   : > { %v1669_v33 = vmul.f32 0.7978846, %v1668_v32 }
0x10f5   : > { %2460 = vtanh.f32 %v1669_v33 }
0x1102   : > { %v2461_v34 = vpop.eup %2460 }
0x1103   : > { %v1671_v35 = vadd.f32 1.0, %v2461_v34 }
0x1105   : > { %v1672_v36 = vmul.f32 %v1671_v35, %v1664_v14 }
0x1107   : > { %v1673_v37 = vpack.c.bf16 %v1672_v36, %v1672_v36 }
0x1109   : > { %2194 = vmatmul.mubr.bf16.vlgmr.msra.gmra.mxu0 %v1673_v37 }
0x11c9   : > { %v1779_v39 = vpop.f32.mrf.mxu0 }
0x11ca   : > { %v1780_v40 = vadd.f32 %v2025_v38, %v1779_v39 }
0x11cb   : > { %v2195_v41 = vpop.f32.mrf.mxu0 }
0x11cc   : > { %v1785_v42 = vadd.f32 %v1780_v40, %v3123_v54 }
0x11cd   : > { %v1782_v43 = vpop.f32.mrf.mxu0 }
0x11ce   : > { %1786 = vst.msk [vmem:[%s568_s24] sm:$0xff] %vm581_vm0, %v1785_v42 }
0x11cf   : > { %v2196_v44 = vpop.f32.mrf.mxu0 }
0x11d0   : > { %2501 = shalt.err (!%p2498_p9)
}
0x11d1   : > { %s2502_s20 = scalar_lea.hbm %s3181_s22, 128  ;;  %s2506_s26 = scalar_lea.hbm %s3286_s21, 256 }
0x11d2   : > { %p2503_p12 = scmp.ne.s32.totalorder %s3181_s22, %s2502_s20  ;;  %p2507_p13 = scmp.lt.s32.totalorder %s3181_s22, %s3286_s21 }
0x11d3   : > { %p2508_p0 = scmp.lt.s32.totalorder %s2506_s26, %s2502_s20 }
0x11d4   : > { %p2504_p10 = pnand %p2503_p12, %p2848_p4 }
0x11d5   : > { %p2509_p1 = por %p2508_p0, %p2507_p13 }
0x11d6   : > { %p2505_p11 = pneg %p2504_p10 }
0x11d8   : > { %p2510_p2 = pnand %p2509_p1, %p2505_p11 }
0x11da   : > { %2513 = shalt.err (!%p2510_p2)
}
0x11db   : > { %2201 = dma.vmem_to_hbm [thread:$0]  (%p2848_p4), %s3183_s28, 128, %s3181_s22, %s1788_s27  }
0x11dc PF: > { %s3287_s0 = sld [smem:[#allocation14_spill]] }
0x11dd   : > { %s3288_s30 = sld [smem:[#allocation11_spill]] }
0x11e2   : > { %p2213_p3 = scmp.ge.s32.totalorder %s3287_s0, 2 }
0x11e3   : > { %s1814_s17 = sand.u32 1, %s3288_s30  }
0x11e4   : > { %p2208_p5 = pnand %p2213_p3, %p2855_p8  ;;  %s1815_s23 = scalar_lea.sflag [#allocation7], %s1814_s17 }
0x11e6   : > { %p2209_p6 = pneg %p2208_p5 }
0x11e8   : > { %2607 = dma.done.wait (%p2209_p6), %s1815_s23, 128  }
0x11e9   : > { %2609 = vsyncadd (%p2209_p6), %s1815_s23, 4294967168  ;;  %s31_s29 = sadd.s32 1, %s3287_s0   ;;  %s3290_s1 = sld [smem:[#allocation12_spill]] }
0x11ea   : > { %p28_p7 = scmp.ge.s32.totalorder %s31_s29, 4   ;;  %s3291_s26 = sld [smem:[#allocation17_spill]] }
0x11eb   : > { %s3292_s27 = sld [smem:[#allocation13_spill]]  ;;  %s3294_s24 = smov %s2616_s25 }
0x11ec   : > { %s3293_s28 = sld [smem:[#allocation15_spill]]  ;;  %30 = sbr.rel (!%p28_p7) target bundleno = 9 (0x9), region = 213 }
0x11ef   : > { %s3295_s25 = smov %s3290_s1 }
0x11f1   :  { %1820 = vsyncpa [#allocation6], 1 }
0x11f2   :  { %1822 = vsyncpa [#allocation6 + $0x1], 1 }
0x11f3   :  { %1823 = vsyncpa [#allocation7], 1 }
0x11f4   :  { %1825 = vsyncpa [#allocation7 + $0x1], 1 }

</bundles_post_ra>
